<compile_context>
chip_gen: v6e
topology: v6e:2x2x1
jax: 0.10.0
libtpu: 0.0.40
codegen_flags: <defaults>
</compile_context>

<pallas_src>
import functools

import jax
import jax.numpy as jnp
from jax import lax
from jax.experimental import pallas as pl
from jax.experimental.pallas import tpu as pltpu


def _round_up(v, m):
    return ((v + m - 1) // m) * m


# ----------------------------- Pallas kernel -------------------------------

def _lstm_kernel(len_ref, xp_ref, whh_ref, y_ref, hout_ref, h_sc, c_sc, *, tc, hp):
    """One grid step = `tc` timesteps of the recurrence for one batch block.

    len_ref : [Bb, 1]   int32    sequence lengths (constant over the time axis)
    xp_ref  : [tc, Bb, 4*hp]     precomputed x @ W_ih^T + bias for this time chunk
    whh_ref : [hp, 4*hp]         W_hh^T, zero-padded, gate-lane-aligned
    y_ref   : [tc, Bb, hp]       outputs for this chunk (time-major, lane-dense)
    hout_ref: [Bb, hp]           final hidden state (written on the last chunk)
    h_sc,c_sc: VMEM [Bb, hp] f32 carries, persistent across the time grid axis
    """
    t_chunk = pl.program_id(1)

    @pl.when(t_chunk == 0)
    def _():
        h_sc[...] = jnp.zeros_like(h_sc)
        c_sc[...] = jnp.zeros_like(c_sc)

    lens = len_ref[...]                      # [Bb, 1] int32
    whh = whh_ref[...]                       # [hp, 4*hp]
    t_base = t_chunk * tc

    def step(tt, carry):
        h_prev, c_prev = carry
        # Only the recurrent matmul remains inside the sequential loop.
        gates = xp_ref[tt].astype(jnp.float32) + jnp.dot(
            h_prev.astype(whh.dtype), whh, preferred_element_type=jnp.float32)
        # Lane-aligned gate slices (hp is a multiple of 128) -> pure addressing.
        i_g = jax.nn.sigmoid(gates[:, 0 * hp:1 * hp])
        f_g = jax.nn.sigmoid(gates[:, 1 * hp:2 * hp])
        g_g = jnp.tanh(gates[:, 2 * hp:3 * hp])
        o_g = jax.nn.sigmoid(gates[:, 3 * hp:4 * hp])
        c_new = f_g * c_prev + i_g * g_g
        h_new = o_g * jnp.tanh(c_new)
        valid = lens > (t_base + tt)                        # [Bb, 1] bool
        y_ref[tt] = jnp.where(valid, h_new, 0.0)            # 0 past sequence end
        return (jnp.where(valid, h_new, h_prev),            # freeze h past end
                jnp.where(valid, c_new, c_prev))            # freeze c past end

    h_fin, c_fin = lax.fori_loop(0, tc, step, (h_sc[...], c_sc[...]),
                                 unroll=min(tc, 8))
    h_sc[...] = h_fin
    c_sc[...] = c_fin

    @pl.when(t_chunk == pl.num_programs(1) - 1)
    def _():
        hout_ref[...] = h_fin


def lstm_pallas(x, x_len, w_ih, w_hh, b_ih, b_hh, *,
                time_chunk=32, compute_dtype=jnp.float32):
    """x: [B, S, E] float32, x_len: [B] int.
    Returns (y: [B, S, H], h: [B, H]) matching the PyTorch module forward."""
    B, S, E = x.shape
    H = w_ih.shape[0] // 4
    HP = _round_up(H, 128)          # lane-aligned (padded) hidden width
    G = 4 * HP

    BB = B if B <= 8 else 8         # batch block (sublane tile); 'parallel' grid axis
    BP = _round_up(B, BB)
    TC = S if S <= time_chunk else time_chunk
    SP = _round_up(S, TC)

    f32 = jnp.float32
    x = x.astype(f32)

    # --- zero-padded, gate-lane-aligned parameters: gate k at lanes [k*HP, k*HP+H) ---
    wih_t = jnp.asarray(w_ih, f32).T.reshape(E, 4, H)
    wih_pad = jnp.zeros((E, 4, HP), f32).at[:, :, :H].set(wih_t).reshape(E, G)
    whh_t = jnp.asarray(w_hh, f32).T.reshape(H, 4, H)
    whh_pad = jnp.zeros((HP, 4, HP), f32).at[:H, :, :H].set(whh_t).reshape(HP, G)
    bias = (jnp.asarray(b_ih, f32) + jnp.asarray(b_hh, f32)).reshape(4, H)
    bias_pad = jnp.zeros((4, HP), f32).at[:, :H].set(bias).reshape(G)

    # --- hoisted input projection: one big MXU-friendly GEMM, emitted time-major ----
    xp = jnp.einsum('bse,eg->sbg',
                    x.astype(compute_dtype), wih_pad.astype(compute_dtype),
                    preferred_element_type=f32) + bias_pad          # [S, B, G] f32
    xp = jnp.pad(xp, ((0, SP - S), (0, BP - B), (0, 0)))            # [SP, BP, G]

    lens = jnp.pad(x_len.astype(jnp.int32), (0, BP - B)).reshape(BP, 1)
    whh_in = whh_pad.astype(compute_dtype)                          # [HP, G]

    kernel = functools.partial(_lstm_kernel, tc=TC, hp=HP)

    y_tm, h_final = pl.pallas_call(
        kernel,
        out_shape=(
            jax.ShapeDtypeStruct((SP, BP, HP), f32),
            jax.ShapeDtypeStruct((BP, HP), f32),
        ),
        grid_spec=pltpu.PrefetchScalarGridSpec(
            num_scalar_prefetch=0,
            grid=(BP // BB, SP // TC),                       # (batch blocks, time chunks)
            in_specs=[
                pl.BlockSpec((BB, 1), lambda b, t: (b, 0)),          # lengths
                pl.BlockSpec((TC, BB, G), lambda b, t: (t, b, 0)),   # X_proj chunk
                pl.BlockSpec((HP, G), lambda b, t: (0, 0)),          # W_hh^T (resident)
            ],
            out_specs=[
                pl.BlockSpec((TC, BB, HP), lambda b, t: (t, b, 0)),  # y chunk
                pl.BlockSpec((BB, HP), lambda b, t: (b, 0)),         # final h
            ],
            scratch_shapes=[
                pltpu.VMEM((BB, HP), jnp.float32),                   # h carry
                pltpu.VMEM((BB, HP), jnp.float32),                   # c carry
            ],
        ),
        compiler_params=pltpu.CompilerParams(
            dimension_semantics=("parallel", "arbitrary"),
            vmem_limit_bytes=32 * 1024 * 1024),
    )(lens, xp, whh_in)

    # Single small XLA pass: slice off lane/time/batch padding and go batch-first.
    y = jnp.transpose(y_tm[:S, :B, :H], (1, 0, 2))                   # [B, S, H]
    h = h_final[:B, :H]                                              # [B, H]
    return y, h


# --------------------------- pure-JAX reference -----------------------------

def lstm_ref(x, x_len, w_ih, w_hh, b_ih, b_hh):
    B, S, E = x.shape
    H = w_hh.shape[1]
    b = (b_ih + b_hh)[None, :]

    def step(carry, inp):
        h, c = carry
        xt, t = inp
        gates = xt @ w_ih.T + h @ w_hh.T + b
        i_g = jax.nn.sigmoid(gates[:, 0 * H:1 * H])
        f_g = jax.nn.sigmoid(gates[:, 1 * H:2 * H])
        g_g = jnp.tanh(gates[:, 2 * H:3 * H])
        o_g = jax.nn.sigmoid(gates[:, 3 * H:4 * H])
        c_new = f_g * c + i_g * g_g
        h_new = o_g * jnp.tanh(c_new)
        valid = (x_len > t)[:, None]
        h = jnp.where(valid, h_new, h)
        c = jnp.where(valid, c_new, c)
        y = jnp.where(valid, h_new, 0.0)
        return (h, c), y

    (h, _), ys = lax.scan(
        step,
        (jnp.zeros((B, H), jnp.float32), jnp.zeros((B, H), jnp.float32)),
        (jnp.transpose(x, (1, 0, 2)), jnp.arange(S, dtype=jnp.int32)),
    )
    return jnp.transpose(ys, (1, 0, 2)), h


# ------------------------------ parameter init ------------------------------

def init_lstm_params(key, input_size, hidden_size):
    k_hh, k_ih = jax.random.split(key)
    # weight_hh: orthogonal, shape (4H, H)
    a = jax.random.normal(k_hh, (4 * hidden_size, hidden_size), jnp.float32)
    q, r = jnp.linalg.qr(a)
    q = q * jnp.sign(jnp.diagonal(r))[None, :]
    w_hh = q
    # weight_ih: kaiming normal (fan_in = input_size, gain = sqrt(2))
    std = (2.0 / input_size) ** 0.5
    w_ih = jax.random.normal(
        k_ih, (4 * hidden_size, input_size), jnp.float32) * std
    # biases: zeros, except forget-gate chunk of bias_hh set to 1
    b_ih = jnp.zeros((4 * hidden_size,), jnp.float32)
    b_hh = jnp.zeros((4 * hidden_size,), jnp.float32)
    b_hh = b_hh.at[hidden_size:2 * hidden_size].set(1.0)
    return w_ih, w_hh, b_ih, b_hh


# ----------------------------------- main -----------------------------------

if __name__ == "__main__":
    B, S, E, H = 2, 8, 16, 32

    key = jax.random.PRNGKey(0)
    k_x, k_p = jax.random.split(key)
    x = jax.random.normal(k_x, (B, S, E), jnp.float32)
    x_len = jnp.array([8, 5], dtype=jnp.int32)    # variable lengths <= S

    w_ih, w_hh, b_ih, b_hh = init_lstm_params(k_p, E, H)

    run = jax.jit(lstm_pallas)
    y, h = run(x, x_len, w_ih, w_hh, b_ih, b_hh)
    jax.block_until_ready((y, h))

    y_ref, h_ref = lstm_ref(x, x_len, w_ih, w_hh, b_ih, b_hh)
    assert y.shape == (B, S, H) and h.shape == (B, H)
    assert jnp.allclose(y, y_ref, atol=3e-5, rtol=3e-5)
    assert jnp.allclose(h, h_ref, atol=3e-5, rtol=3e-5)

    print("KERNEL_OK")
</pallas_src>

<mosaic_0001>
module attributes {stable_mosaic.version = 11 : i64} {
  func.func @_lstm_kernel(%arg0: i32, %arg1: i32, %arg2: memref<2x1xi32, #tpu.memory_space<vmem>>, %arg3: memref<8x2x512xf32, #tpu.memory_space<vmem>>, %arg4: memref<128x512xf32, #tpu.memory_space<vmem>>, %arg5: memref<8x2x128xf32, #tpu.memory_space<vmem>>, %arg6: memref<2x128xf32, #tpu.memory_space<vmem>>, %arg7: memref<2x128xf32, #tpu.memory_space<vmem>>, %arg8: memref<2x128xf32, #tpu.memory_space<vmem>>) attributes {dimension_semantics = [#tpu.dimension_semantics<parallel>, #tpu.dimension_semantics<arbitrary>], iteration_bounds = array<i64: 1, 1>, scalar_prefetch = 0 : i64, scratch_operands = 2 : i64, tpu.core_type = #tpu.core_type<tc>, window_params = [{transform_indices = @transform_0, window_bounds = array<i64: 2, 1>}, {transform_indices = @transform_1, window_bounds = array<i64: 8, 2, 512>}, {pipeline_mode = #tpu.pipeline_mode<synchronous>, transform_indices = @transform_2, window_bounds = array<i64: 128, 512>}, {transform_indices = @transform_3, window_bounds = array<i64: 8, 2, 128>}, {transform_indices = @transform_4, window_bounds = array<i64: 2, 128>}]} {
    %c0_i32 = arith.constant 0 : i32
    %0 = arith.cmpi eq, %arg1, %c0_i32 : i32
    %1 = arith.extui %0 : i1 to i32
    %c0_i32_0 = arith.constant 0 : i32
    %2 = arith.cmpi ne, %1, %c0_i32_0 : i32
    scf.if %2 {
      %cst_87 = arith.constant 0.000000e+00 : f32
      %389 = vector.broadcast %cst_87 : f32 to vector<2x128xf32>
      %c0_88 = arith.constant 0 : index
      %c0_89 = arith.constant 0 : index
      %390 = vector.load %arg7[%c0_88, %c0_89] : memref<2x128xf32, #tpu.memory_space<vmem>>, vector<2x128xf32>
      tpu.vector_store %arg7[%c0_88, %c0_89], %389 {strides = array<i32>} : memref<2x128xf32, #tpu.memory_space<vmem>>, vector<2x128xf32>,
      %cst_90 = arith.constant 0.000000e+00 : f32
      %391 = vector.broadcast %cst_90 : f32 to vector<2x128xf32>
      %c0_91 = arith.constant 0 : index
      %c0_92 = arith.constant 0 : index
      %392 = vector.load %arg8[%c0_91, %c0_92] : memref<2x128xf32, #tpu.memory_space<vmem>>, vector<2x128xf32>
      tpu.vector_store %arg8[%c0_91, %c0_92], %391 {strides = array<i32>} : memref<2x128xf32, #tpu.memory_space<vmem>>, vector<2x128xf32>,
    } else {
    }
    %c0 = arith.constant 0 : index
    %c0_1 = arith.constant 0 : index
    %3 = vector.load %arg2[%c0, %c0_1] : memref<2x1xi32, #tpu.memory_space<vmem>>, vector<2x1xi32>
    %c0_2 = arith.constant 0 : index
    %c0_3 = arith.constant 0 : index
    %4 = vector.load %arg4[%c0_2, %c0_3] : memref<128x512xf32, #tpu.memory_space<vmem>>, vector<128x512xf32>
    %c8_i32 = arith.constant 8 : i32
    %5 = arith.muli %arg1, %c8_i32 : i32
    %c0_4 = arith.constant 0 : index
    %c0_5 = arith.constant 0 : index
    %6 = vector.load %arg7[%c0_4, %c0_5] : memref<2x128xf32, #tpu.memory_space<vmem>>, vector<2x128xf32>
    %c0_6 = arith.constant 0 : index
    %c0_7 = arith.constant 0 : index
    %7 = vector.load %arg8[%c0_6, %c0_7] : memref<2x128xf32, #tpu.memory_space<vmem>>, vector<2x128xf32>
    %c0_i32_8 = arith.constant 0 : i32
    %8 = arith.index_cast %c0_i32_8 : i32 to index
    %c0_9 = arith.constant 0 : index
    %c0_10 = arith.constant 0 : index
    %9 = vector.load %arg3[%8, %c0_9, %c0_10] : memref<8x2x512xf32, #tpu.memory_space<vmem>>, vector<1x2x512xf32>
    %10 = vector.shape_cast %9 : vector<1x2x512xf32> to vector<2x512xf32>
    %cst = arith.constant dense<0.000000e+00> : vector<2x512xf32>
    %11 = tpu.matmul %6, %4, %cst {dimension_numbers = #tpu.dot_dimension_numbers<[1], [0], [0], [1], [0, 0, 1, 1], [], []>} : vector<2x128xf32>, vector<128x512xf32>, vector<2x512xf32> -> vector<2x512xf32>
    %12 = arith.addf %10, %11 : vector<2x512xf32>
    %13 = vector.extract_strided_slice %12 {offsets = [0, 0], sizes = [2, 128], strides = [1, 1]} : vector<2x512xf32> to vector<2x128xf32>
    %14 = arith.negf %13 : vector<2x128xf32>
    %15 = math.exp %14 : vector<2x128xf32>
    %cst_11 = arith.constant 1.000000e+00 : f32
    %16 = vector.broadcast %cst_11 : f32 to vector<2x128xf32>
    %17 = arith.addf %16, %15 : vector<2x128xf32>
    %18 = arith.divf %16, %17 : vector<2x128xf32>
    %19 = vector.extract_strided_slice %12 {offsets = [0, 128], sizes = [2, 128], strides = [1, 1]} : vector<2x512xf32> to vector<2x128xf32>
    %20 = arith.negf %19 : vector<2x128xf32>
    %21 = math.exp %20 : vector<2x128xf32>
    %cst_12 = arith.constant 1.000000e+00 : f32
    %22 = vector.broadcast %cst_12 : f32 to vector<2x128xf32>
    %23 = arith.addf %22, %21 : vector<2x128xf32>
    %24 = arith.divf %22, %23 : vector<2x128xf32>
    %25 = vector.extract_strided_slice %12 {offsets = [0, 256], sizes = [2, 128], strides = [1, 1]} : vector<2x512xf32> to vector<2x128xf32>
    %26 = math.tanh %25 : vector<2x128xf32>
    %27 = vector.extract_strided_slice %12 {offsets = [0, 384], sizes = [2, 128], strides = [1, 1]} : vector<2x512xf32> to vector<2x128xf32>
    %28 = arith.negf %27 : vector<2x128xf32>
    %29 = math.exp %28 : vector<2x128xf32>
    %cst_13 = arith.constant 1.000000e+00 : f32
    %30 = vector.broadcast %cst_13 : f32 to vector<2x128xf32>
    %31 = arith.addf %30, %29 : vector<2x128xf32>
    %32 = arith.divf %30, %31 : vector<2x128xf32>
    %33 = arith.mulf %24, %7 : vector<2x128xf32>
    %34 = arith.mulf %18, %26 : vector<2x128xf32>
    %35 = arith.addf %33, %34 : vector<2x128xf32>
    %36 = math.tanh %35 : vector<2x128xf32>
    %37 = arith.mulf %32, %36 : vector<2x128xf32>
    %38 = arith.addi %5, %c0_i32_8 : i32
    %39 = vector.broadcast %38 : i32 to vector<2x1xi32>
    %40 = arith.cmpi sgt, %3, %39 : vector<2x1xi32>
    %cst_14 = arith.constant 0.000000e+00 : f32
    %41 = vector.shape_cast %40 : vector<2x1xi1> to vector<2x1xi1>
    %42 = vector.broadcast %41 : vector<2x1xi1> to vector<2x128xi1>
    %43 = vector.broadcast %cst_14 : f32 to vector<2x128xf32>
    %44 = arith.select %42, %37, %43 : vector<2x128xi1>, vector<2x128xf32>
    %45 = arith.index_cast %c0_i32_8 : i32 to index
    %c0_15 = arith.constant 0 : index
    %c0_16 = arith.constant 0 : index
    %46 = vector.load %arg5[%45, %c0_15, %c0_16] : memref<8x2x128xf32, #tpu.memory_space<vmem>>, vector<1x2x128xf32>
    %47 = vector.shape_cast %46 : vector<1x2x128xf32> to vector<2x128xf32>
    %48 = vector.shape_cast %44 : vector<2x128xf32> to vector<1x2x128xf32>
    tpu.vector_store %arg5[%45, %c0_15, %c0_16], %48 {strides = array<i32>} : memref<8x2x128xf32, #tpu.memory_space<vmem>>, vector<1x2x128xf32>,
    %49 = vector.shape_cast %40 : vector<2x1xi1> to vector<2x1xi1>
    %50 = vector.broadcast %49 : vector<2x1xi1> to vector<2x128xi1>
    %51 = arith.select %50, %37, %6 : vector<2x128xi1>, vector<2x128xf32>
    %52 = vector.shape_cast %40 : vector<2x1xi1> to vector<2x1xi1>
    %53 = vector.broadcast %52 : vector<2x1xi1> to vector<2x128xi1>
    %54 = arith.select %53, %35, %7 : vector<2x128xi1>, vector<2x128xf32>
    %c1_i32 = arith.constant 1 : i32
    %55 = arith.index_cast %c1_i32 : i32 to index
    %c0_17 = arith.constant 0 : index
    %c0_18 = arith.constant 0 : index
    %56 = vector.load %arg3[%55, %c0_17, %c0_18] : memref<8x2x512xf32, #tpu.memory_space<vmem>>, vector<1x2x512xf32>
    %57 = vector.shape_cast %56 : vector<1x2x512xf32> to vector<2x512xf32>
    %cst_19 = arith.constant dense<0.000000e+00> : vector<2x512xf32>
    %58 = tpu.matmul %51, %4, %cst_19 {dimension_numbers = #tpu.dot_dimension_numbers<[1], [0], [0], [1], [0, 0, 1, 1], [], []>} : vector<2x128xf32>, vector<128x512xf32>, vector<2x512xf32> -> vector<2x512xf32>
    %59 = arith.addf %57, %58 : vector<2x512xf32>
    %60 = vector.extract_strided_slice %59 {offsets = [0, 0], sizes = [2, 128], strides = [1, 1]} : vector<2x512xf32> to vector<2x128xf32>
    %61 = arith.negf %60 : vector<2x128xf32>
    %62 = math.exp %61 : vector<2x128xf32>
    %cst_20 = arith.constant 1.000000e+00 : f32
    %63 = vector.broadcast %cst_20 : f32 to vector<2x128xf32>
    %64 = arith.addf %63, %62 : vector<2x128xf32>
    %65 = arith.divf %63, %64 : vector<2x128xf32>
    %66 = vector.extract_strided_slice %59 {offsets = [0, 128], sizes = [2, 128], strides = [1, 1]} : vector<2x512xf32> to vector<2x128xf32>
    %67 = arith.negf %66 : vector<2x128xf32>
    %68 = math.exp %67 : vector<2x128xf32>
    %cst_21 = arith.constant 1.000000e+00 : f32
    %69 = vector.broadcast %cst_21 : f32 to vector<2x128xf32>
    %70 = arith.addf %69, %68 : vector<2x128xf32>
    %71 = arith.divf %69, %70 : vector<2x128xf32>
    %72 = vector.extract_strided_slice %59 {offsets = [0, 256], sizes = [2, 128], strides = [1, 1]} : vector<2x512xf32> to vector<2x128xf32>
    %73 = math.tanh %72 : vector<2x128xf32>
    %74 = vector.extract_strided_slice %59 {offsets = [0, 384], sizes = [2, 128], strides = [1, 1]} : vector<2x512xf32> to vector<2x128xf32>
    %75 = arith.negf %74 : vector<2x128xf32>
    %76 = math.exp %75 : vector<2x128xf32>
    %cst_22 = arith.constant 1.000000e+00 : f32
    %77 = vector.broadcast %cst_22 : f32 to vector<2x128xf32>
    %78 = arith.addf %77, %76 : vector<2x128xf32>
    %79 = arith.divf %77, %78 : vector<2x128xf32>
    %80 = arith.mulf %71, %54 : vector<2x128xf32>
    %81 = arith.mulf %65, %73 : vector<2x128xf32>
    %82 = arith.addf %80, %81 : vector<2x128xf32>
    %83 = math.tanh %82 : vector<2x128xf32>
    %84 = arith.mulf %79, %83 : vector<2x128xf32>
    %85 = arith.addi %5, %c1_i32 : i32
    %86 = vector.broadcast %85 : i32 to vector<2x1xi32>
    %87 = arith.cmpi sgt, %3, %86 : vector<2x1xi32>
    %cst_23 = arith.constant 0.000000e+00 : f32
    %88 = vector.shape_cast %87 : vector<2x1xi1> to vector<2x1xi1>
    %89 = vector.broadcast %88 : vector<2x1xi1> to vector<2x128xi1>
    %90 = vector.broadcast %cst_23 : f32 to vector<2x128xf32>
    %91 = arith.select %89, %84, %90 : vector<2x128xi1>, vector<2x128xf32>
    %92 = arith.index_cast %c1_i32 : i32 to index
    %c0_24 = arith.constant 0 : index
    %c0_25 = arith.constant 0 : index
    %93 = vector.load %arg5[%92, %c0_24, %c0_25] : memref<8x2x128xf32, #tpu.memory_space<vmem>>, vector<1x2x128xf32>
    %94 = vector.shape_cast %93 : vector<1x2x128xf32> to vector<2x128xf32>
    %95 = vector.shape_cast %91 : vector<2x128xf32> to vector<1x2x128xf32>
    tpu.vector_store %arg5[%92, %c0_24, %c0_25], %95 {strides = array<i32>} : memref<8x2x128xf32, #tpu.memory_space<vmem>>, vector<1x2x128xf32>,
    %96 = vector.shape_cast %87 : vector<2x1xi1> to vector<2x1xi1>
    %97 = vector.broadcast %96 : vector<2x1xi1> to vector<2x128xi1>
    %98 = arith.select %97, %84, %51 : vector<2x128xi1>, vector<2x128xf32>
    %99 = vector.shape_cast %87 : vector<2x1xi1> to vector<2x1xi1>
    %100 = vector.broadcast %99 : vector<2x1xi1> to vector<2x128xi1>
    %101 = arith.select %100, %82, %54 : vector<2x128xi1>, vector<2x128xf32>
    %c2_i32 = arith.constant 2 : i32
    %102 = arith.index_cast %c2_i32 : i32 to index
    %c0_26 = arith.constant 0 : index
    %c0_27 = arith.constant 0 : index
    %103 = vector.load %arg3[%102, %c0_26, %c0_27] : memref<8x2x512xf32, #tpu.memory_space<vmem>>, vector<1x2x512xf32>
    %104 = vector.shape_cast %103 : vector<1x2x512xf32> to vector<2x512xf32>
    %cst_28 = arith.constant dense<0.000000e+00> : vector<2x512xf32>
    %105 = tpu.matmul %98, %4, %cst_28 {dimension_numbers = #tpu.dot_dimension_numbers<[1], [0], [0], [1], [0, 0, 1, 1], [], []>} : vector<2x128xf32>, vector<128x512xf32>, vector<2x512xf32> -> vector<2x512xf32>
    %106 = arith.addf %104, %105 : vector<2x512xf32>
    %107 = vector.extract_strided_slice %106 {offsets = [0, 0], sizes = [2, 128], strides = [1, 1]} : vector<2x512xf32> to vector<2x128xf32>
    %108 = arith.negf %107 : vector<2x128xf32>
    %109 = math.exp %108 : vector<2x128xf32>
    %cst_29 = arith.constant 1.000000e+00 : f32
    %110 = vector.broadcast %cst_29 : f32 to vector<2x128xf32>
    %111 = arith.addf %110, %109 : vector<2x128xf32>
    %112 = arith.divf %110, %111 : vector<2x128xf32>
    %113 = vector.extract_strided_slice %106 {offsets = [0, 128], sizes = [2, 128], strides = [1, 1]} : vector<2x512xf32> to vector<2x128xf32>
    %114 = arith.negf %113 : vector<2x128xf32>
    %115 = math.exp %114 : vector<2x128xf32>
    %cst_30 = arith.constant 1.000000e+00 : f32
    %116 = vector.broadcast %cst_30 : f32 to vector<2x128xf32>
    %117 = arith.addf %116, %115 : vector<2x128xf32>
    %118 = arith.divf %116, %117 : vector<2x128xf32>
    %119 = vector.extract_strided_slice %106 {offsets = [0, 256], sizes = [2, 128], strides = [1, 1]} : vector<2x512xf32> to vector<2x128xf32>
    %120 = math.tanh %119 : vector<2x128xf32>
    %121 = vector.extract_strided_slice %106 {offsets = [0, 384], sizes = [2, 128], strides = [1, 1]} : vector<2x512xf32> to vector<2x128xf32>
    %122 = arith.negf %121 : vector<2x128xf32>
    %123 = math.exp %122 : vector<2x128xf32>
    %cst_31 = arith.constant 1.000000e+00 : f32
    %124 = vector.broadcast %cst_31 : f32 to vector<2x128xf32>
    %125 = arith.addf %124, %123 : vector<2x128xf32>
    %126 = arith.divf %124, %125 : vector<2x128xf32>
    %127 = arith.mulf %118, %101 : vector<2x128xf32>
    %128 = arith.mulf %112, %120 : vector<2x128xf32>
    %129 = arith.addf %127, %128 : vector<2x128xf32>
    %130 = math.tanh %129 : vector<2x128xf32>
    %131 = arith.mulf %126, %130 : vector<2x128xf32>
    %132 = arith.addi %5, %c2_i32 : i32
    %133 = vector.broadcast %132 : i32 to vector<2x1xi32>
    %134 = arith.cmpi sgt, %3, %133 : vector<2x1xi32>
    %cst_32 = arith.constant 0.000000e+00 : f32
    %135 = vector.shape_cast %134 : vector<2x1xi1> to vector<2x1xi1>
    %136 = vector.broadcast %135 : vector<2x1xi1> to vector<2x128xi1>
    %137 = vector.broadcast %cst_32 : f32 to vector<2x128xf32>
    %138 = arith.select %136, %131, %137 : vector<2x128xi1>, vector<2x128xf32>
    %139 = arith.index_cast %c2_i32 : i32 to index
    %c0_33 = arith.constant 0 : index
    %c0_34 = arith.constant 0 : index
    %140 = vector.load %arg5[%139, %c0_33, %c0_34] : memref<8x2x128xf32, #tpu.memory_space<vmem>>, vector<1x2x128xf32>
    %141 = vector.shape_cast %140 : vector<1x2x128xf32> to vector<2x128xf32>
    %142 = vector.shape_cast %138 : vector<2x128xf32> to vector<1x2x128xf32>
    tpu.vector_store %arg5[%139, %c0_33, %c0_34], %142 {strides = array<i32>} : memref<8x2x128xf32, #tpu.memory_space<vmem>>, vector<1x2x128xf32>,
    %143 = vector.shape_cast %134 : vector<2x1xi1> to vector<2x1xi1>
    %144 = vector.broadcast %143 : vector<2x1xi1> to vector<2x128xi1>
    %145 = arith.select %144, %131, %98 : vector<2x128xi1>, vector<2x128xf32>
    %146 = vector.shape_cast %134 : vector<2x1xi1> to vector<2x1xi1>
    %147 = vector.broadcast %146 : vector<2x1xi1> to vector<2x128xi1>
    %148 = arith.select %147, %129, %101 : vector<2x128xi1>, vector<2x128xf32>
    %c3_i32 = arith.constant 3 : i32
    %149 = arith.index_cast %c3_i32 : i32 to index
    %c0_35 = arith.constant 0 : index
    %c0_36 = arith.constant 0 : index
    %150 = vector.load %arg3[%149, %c0_35, %c0_36] : memref<8x2x512xf32, #tpu.memory_space<vmem>>, vector<1x2x512xf32>
    %151 = vector.shape_cast %150 : vector<1x2x512xf32> to vector<2x512xf32>
    %cst_37 = arith.constant dense<0.000000e+00> : vector<2x512xf32>
    %152 = tpu.matmul %145, %4, %cst_37 {dimension_numbers = #tpu.dot_dimension_numbers<[1], [0], [0], [1], [0, 0, 1, 1], [], []>} : vector<2x128xf32>, vector<128x512xf32>, vector<2x512xf32> -> vector<2x512xf32>
    %153 = arith.addf %151, %152 : vector<2x512xf32>
    %154 = vector.extract_strided_slice %153 {offsets = [0, 0], sizes = [2, 128], strides = [1, 1]} : vector<2x512xf32> to vector<2x128xf32>
    %155 = arith.negf %154 : vector<2x128xf32>
    %156 = math.exp %155 : vector<2x128xf32>
    %cst_38 = arith.constant 1.000000e+00 : f32
    %157 = vector.broadcast %cst_38 : f32 to vector<2x128xf32>
    %158 = arith.addf %157, %156 : vector<2x128xf32>
    %159 = arith.divf %157, %158 : vector<2x128xf32>
    %160 = vector.extract_strided_slice %153 {offsets = [0, 128], sizes = [2, 128], strides = [1, 1]} : vector<2x512xf32> to vector<2x128xf32>
    %161 = arith.negf %160 : vector<2x128xf32>
    %162 = math.exp %161 : vector<2x128xf32>
    %cst_39 = arith.constant 1.000000e+00 : f32
    %163 = vector.broadcast %cst_39 : f32 to vector<2x128xf32>
    %164 = arith.addf %163, %162 : vector<2x128xf32>
    %165 = arith.divf %163, %164 : vector<2x128xf32>
    %166 = vector.extract_strided_slice %153 {offsets = [0, 256], sizes = [2, 128], strides = [1, 1]} : vector<2x512xf32> to vector<2x128xf32>
    %167 = math.tanh %166 : vector<2x128xf32>
    %168 = vector.extract_strided_slice %153 {offsets = [0, 384], sizes = [2, 128], strides = [1, 1]} : vector<2x512xf32> to vector<2x128xf32>
    %169 = arith.negf %168 : vector<2x128xf32>
    %170 = math.exp %169 : vector<2x128xf32>
    %cst_40 = arith.constant 1.000000e+00 : f32
    %171 = vector.broadcast %cst_40 : f32 to vector<2x128xf32>
    %172 = arith.addf %171, %170 : vector<2x128xf32>
    %173 = arith.divf %171, %172 : vector<2x128xf32>
    %174 = arith.mulf %165, %148 : vector<2x128xf32>
    %175 = arith.mulf %159, %167 : vector<2x128xf32>
    %176 = arith.addf %174, %175 : vector<2x128xf32>
    %177 = math.tanh %176 : vector<2x128xf32>
    %178 = arith.mulf %173, %177 : vector<2x128xf32>
    %179 = arith.addi %5, %c3_i32 : i32
    %180 = vector.broadcast %179 : i32 to vector<2x1xi32>
    %181 = arith.cmpi sgt, %3, %180 : vector<2x1xi32>
    %cst_41 = arith.constant 0.000000e+00 : f32
    %182 = vector.shape_cast %181 : vector<2x1xi1> to vector<2x1xi1>
    %183 = vector.broadcast %182 : vector<2x1xi1> to vector<2x128xi1>
    %184 = vector.broadcast %cst_41 : f32 to vector<2x128xf32>
    %185 = arith.select %183, %178, %184 : vector<2x128xi1>, vector<2x128xf32>
    %186 = arith.index_cast %c3_i32 : i32 to index
    %c0_42 = arith.constant 0 : index
    %c0_43 = arith.constant 0 : index
    %187 = vector.load %arg5[%186, %c0_42, %c0_43] : memref<8x2x128xf32, #tpu.memory_space<vmem>>, vector<1x2x128xf32>
    %188 = vector.shape_cast %187 : vector<1x2x128xf32> to vector<2x128xf32>
    %189 = vector.shape_cast %185 : vector<2x128xf32> to vector<1x2x128xf32>
    tpu.vector_store %arg5[%186, %c0_42, %c0_43], %189 {strides = array<i32>} : memref<8x2x128xf32, #tpu.memory_space<vmem>>, vector<1x2x128xf32>,
    %190 = vector.shape_cast %181 : vector<2x1xi1> to vector<2x1xi1>
    %191 = vector.broadcast %190 : vector<2x1xi1> to vector<2x128xi1>
    %192 = arith.select %191, %178, %145 : vector<2x128xi1>, vector<2x128xf32>
    %193 = vector.shape_cast %181 : vector<2x1xi1> to vector<2x1xi1>
    %194 = vector.broadcast %193 : vector<2x1xi1> to vector<2x128xi1>
    %195 = arith.select %194, %176, %148 : vector<2x128xi1>, vector<2x128xf32>
    %c4_i32 = arith.constant 4 : i32
    %196 = arith.index_cast %c4_i32 : i32 to index
    %c0_44 = arith.constant 0 : index
    %c0_45 = arith.constant 0 : index
    %197 = vector.load %arg3[%196, %c0_44, %c0_45] : memref<8x2x512xf32, #tpu.memory_space<vmem>>, vector<1x2x512xf32>
    %198 = vector.shape_cast %197 : vector<1x2x512xf32> to vector<2x512xf32>
    %cst_46 = arith.constant dense<0.000000e+00> : vector<2x512xf32>
    %199 = tpu.matmul %192, %4, %cst_46 {dimension_numbers = #tpu.dot_dimension_numbers<[1], [0], [0], [1], [0, 0, 1, 1], [], []>} : vector<2x128xf32>, vector<128x512xf32>, vector<2x512xf32> -> vector<2x512xf32>
    %200 = arith.addf %198, %199 : vector<2x512xf32>
    %201 = vector.extract_strided_slice %200 {offsets = [0, 0], sizes = [2, 128], strides = [1, 1]} : vector<2x512xf32> to vector<2x128xf32>
    %202 = arith.negf %201 : vector<2x128xf32>
    %203 = math.exp %202 : vector<2x128xf32>
    %cst_47 = arith.constant 1.000000e+00 : f32
    %204 = vector.broadcast %cst_47 : f32 to vector<2x128xf32>
    %205 = arith.addf %204, %203 : vector<2x128xf32>
    %206 = arith.divf %204, %205 : vector<2x128xf32>
    %207 = vector.extract_strided_slice %200 {offsets = [0, 128], sizes = [2, 128], strides = [1, 1]} : vector<2x512xf32> to vector<2x128xf32>
    %208 = arith.negf %207 : vector<2x128xf32>
    %209 = math.exp %208 : vector<2x128xf32>
    %cst_48 = arith.constant 1.000000e+00 : f32
    %210 = vector.broadcast %cst_48 : f32 to vector<2x128xf32>
    %211 = arith.addf %210, %209 : vector<2x128xf32>
    %212 = arith.divf %210, %211 : vector<2x128xf32>
    %213 = vector.extract_strided_slice %200 {offsets = [0, 256], sizes = [2, 128], strides = [1, 1]} : vector<2x512xf32> to vector<2x128xf32>
    %214 = math.tanh %213 : vector<2x128xf32>
    %215 = vector.extract_strided_slice %200 {offsets = [0, 384], sizes = [2, 128], strides = [1, 1]} : vector<2x512xf32> to vector<2x128xf32>
    %216 = arith.negf %215 : vector<2x128xf32>
    %217 = math.exp %216 : vector<2x128xf32>
    %cst_49 = arith.constant 1.000000e+00 : f32
    %218 = vector.broadcast %cst_49 : f32 to vector<2x128xf32>
    %219 = arith.addf %218, %217 : vector<2x128xf32>
    %220 = arith.divf %218, %219 : vector<2x128xf32>
    %221 = arith.mulf %212, %195 : vector<2x128xf32>
    %222 = arith.mulf %206, %214 : vector<2x128xf32>
    %223 = arith.addf %221, %222 : vector<2x128xf32>
    %224 = math.tanh %223 : vector<2x128xf32>
    %225 = arith.mulf %220, %224 : vector<2x128xf32>
    %226 = arith.addi %5, %c4_i32 : i32
    %227 = vector.broadcast %226 : i32 to vector<2x1xi32>
    %228 = arith.cmpi sgt, %3, %227 : vector<2x1xi32>
    %cst_50 = arith.constant 0.000000e+00 : f32
    %229 = vector.shape_cast %228 : vector<2x1xi1> to vector<2x1xi1>
    %230 = vector.broadcast %229 : vector<2x1xi1> to vector<2x128xi1>
    %231 = vector.broadcast %cst_50 : f32 to vector<2x128xf32>
    %232 = arith.select %230, %225, %231 : vector<2x128xi1>, vector<2x128xf32>
    %233 = arith.index_cast %c4_i32 : i32 to index
    %c0_51 = arith.constant 0 : index
    %c0_52 = arith.constant 0 : index
    %234 = vector.load %arg5[%233, %c0_51, %c0_52] : memref<8x2x128xf32, #tpu.memory_space<vmem>>, vector<1x2x128xf32>
    %235 = vector.shape_cast %234 : vector<1x2x128xf32> to vector<2x128xf32>
    %236 = vector.shape_cast %232 : vector<2x128xf32> to vector<1x2x128xf32>
    tpu.vector_store %arg5[%233, %c0_51, %c0_52], %236 {strides = array<i32>} : memref<8x2x128xf32, #tpu.memory_space<vmem>>, vector<1x2x128xf32>,
    %237 = vector.shape_cast %228 : vector<2x1xi1> to vector<2x1xi1>
    %238 = vector.broadcast %237 : vector<2x1xi1> to vector<2x128xi1>
    %239 = arith.select %238, %225, %192 : vector<2x128xi1>, vector<2x128xf32>
    %240 = vector.shape_cast %228 : vector<2x1xi1> to vector<2x1xi1>
    %241 = vector.broadcast %240 : vector<2x1xi1> to vector<2x128xi1>
    %242 = arith.select %241, %223, %195 : vector<2x128xi1>, vector<2x128xf32>
    %c5_i32 = arith.constant 5 : i32
    %243 = arith.index_cast %c5_i32 : i32 to index
    %c0_53 = arith.constant 0 : index
    %c0_54 = arith.constant 0 : index
    %244 = vector.load %arg3[%243, %c0_53, %c0_54] : memref<8x2x512xf32, #tpu.memory_space<vmem>>, vector<1x2x512xf32>
    %245 = vector.shape_cast %244 : vector<1x2x512xf32> to vector<2x512xf32>
    %cst_55 = arith.constant dense<0.000000e+00> : vector<2x512xf32>
    %246 = tpu.matmul %239, %4, %cst_55 {dimension_numbers = #tpu.dot_dimension_numbers<[1], [0], [0], [1], [0, 0, 1, 1], [], []>} : vector<2x128xf32>, vector<128x512xf32>, vector<2x512xf32> -> vector<2x512xf32>
    %247 = arith.addf %245, %246 : vector<2x512xf32>
    %248 = vector.extract_strided_slice %247 {offsets = [0, 0], sizes = [2, 128], strides = [1, 1]} : vector<2x512xf32> to vector<2x128xf32>
    %249 = arith.negf %248 : vector<2x128xf32>
    %250 = math.exp %249 : vector<2x128xf32>
    %cst_56 = arith.constant 1.000000e+00 : f32
    %251 = vector.broadcast %cst_56 : f32 to vector<2x128xf32>
    %252 = arith.addf %251, %250 : vector<2x128xf32>
    %253 = arith.divf %251, %252 : vector<2x128xf32>
    %254 = vector.extract_strided_slice %247 {offsets = [0, 128], sizes = [2, 128], strides = [1, 1]} : vector<2x512xf32> to vector<2x128xf32>
    %255 = arith.negf %254 : vector<2x128xf32>
    %256 = math.exp %255 : vector<2x128xf32>
    %cst_57 = arith.constant 1.000000e+00 : f32
    %257 = vector.broadcast %cst_57 : f32 to vector<2x128xf32>
    %258 = arith.addf %257, %256 : vector<2x128xf32>
    %259 = arith.divf %257, %258 : vector<2x128xf32>
    %260 = vector.extract_strided_slice %247 {offsets = [0, 256], sizes = [2, 128], strides = [1, 1]} : vector<2x512xf32> to vector<2x128xf32>
    %261 = math.tanh %260 : vector<2x128xf32>
    %262 = vector.extract_strided_slice %247 {offsets = [0, 384], sizes = [2, 128], strides = [1, 1]} : vector<2x512xf32> to vector<2x128xf32>
    %263 = arith.negf %262 : vector<2x128xf32>
    %264 = math.exp %263 : vector<2x128xf32>
    %cst_58 = arith.constant 1.000000e+00 : f32
    %265 = vector.broadcast %cst_58 : f32 to vector<2x128xf32>
    %266 = arith.addf %265, %264 : vector<2x128xf32>
    %267 = arith.divf %265, %266 : vector<2x128xf32>
    %268 = arith.mulf %259, %242 : vector<2x128xf32>
    %269 = arith.mulf %253, %261 : vector<2x128xf32>
    %270 = arith.addf %268, %269 : vector<2x128xf32>
    %271 = math.tanh %270 : vector<2x128xf32>
    %272 = arith.mulf %267, %271 : vector<2x128xf32>
    %273 = arith.addi %5, %c5_i32 : i32
    %274 = vector.broadcast %273 : i32 to vector<2x1xi32>
    %275 = arith.cmpi sgt, %3, %274 : vector<2x1xi32>
    %cst_59 = arith.constant 0.000000e+00 : f32
    %276 = vector.shape_cast %275 : vector<2x1xi1> to vector<2x1xi1>
    %277 = vector.broadcast %276 : vector<2x1xi1> to vector<2x128xi1>
    %278 = vector.broadcast %cst_59 : f32 to vector<2x128xf32>
    %279 = arith.select %277, %272, %278 : vector<2x128xi1>, vector<2x128xf32>
    %280 = arith.index_cast %c5_i32 : i32 to index
    %c0_60 = arith.constant 0 : index
    %c0_61 = arith.constant 0 : index
    %281 = vector.load %arg5[%280, %c0_60, %c0_61] : memref<8x2x128xf32, #tpu.memory_space<vmem>>, vector<1x2x128xf32>
    %282 = vector.shape_cast %281 : vector<1x2x128xf32> to vector<2x128xf32>
    %283 = vector.shape_cast %279 : vector<2x128xf32> to vector<1x2x128xf32>
    tpu.vector_store %arg5[%280, %c0_60, %c0_61], %283 {strides = array<i32>} : memref<8x2x128xf32, #tpu.memory_space<vmem>>, vector<1x2x128xf32>,
    %284 = vector.shape_cast %275 : vector<2x1xi1> to vector<2x1xi1>
    %285 = vector.broadcast %284 : vector<2x1xi1> to vector<2x128xi1>
    %286 = arith.select %285, %272, %239 : vector<2x128xi1>, vector<2x128xf32>
    %287 = vector.shape_cast %275 : vector<2x1xi1> to vector<2x1xi1>
    %288 = vector.broadcast %287 : vector<2x1xi1> to vector<2x128xi1>
    %289 = arith.select %288, %270, %242 : vector<2x128xi1>, vector<2x128xf32>
    %c6_i32 = arith.constant 6 : i32
    %290 = arith.index_cast %c6_i32 : i32 to index
    %c0_62 = arith.constant 0 : index
    %c0_63 = arith.constant 0 : index
    %291 = vector.load %arg3[%290, %c0_62, %c0_63] : memref<8x2x512xf32, #tpu.memory_space<vmem>>, vector<1x2x512xf32>
    %292 = vector.shape_cast %291 : vector<1x2x512xf32> to vector<2x512xf32>
    %cst_64 = arith.constant dense<0.000000e+00> : vector<2x512xf32>
    %293 = tpu.matmul %286, %4, %cst_64 {dimension_numbers = #tpu.dot_dimension_numbers<[1], [0], [0], [1], [0, 0, 1, 1], [], []>} : vector<2x128xf32>, vector<128x512xf32>, vector<2x512xf32> -> vector<2x512xf32>
    %294 = arith.addf %292, %293 : vector<2x512xf32>
    %295 = vector.extract_strided_slice %294 {offsets = [0, 0], sizes = [2, 128], strides = [1, 1]} : vector<2x512xf32> to vector<2x128xf32>
    %296 = arith.negf %295 : vector<2x128xf32>
    %297 = math.exp %296 : vector<2x128xf32>
    %cst_65 = arith.constant 1.000000e+00 : f32
    %298 = vector.broadcast %cst_65 : f32 to vector<2x128xf32>
    %299 = arith.addf %298, %297 : vector<2x128xf32>
    %300 = arith.divf %298, %299 : vector<2x128xf32>
    %301 = vector.extract_strided_slice %294 {offsets = [0, 128], sizes = [2, 128], strides = [1, 1]} : vector<2x512xf32> to vector<2x128xf32>
    %302 = arith.negf %301 : vector<2x128xf32>
    %303 = math.exp %302 : vector<2x128xf32>
    %cst_66 = arith.constant 1.000000e+00 : f32
    %304 = vector.broadcast %cst_66 : f32 to vector<2x128xf32>
    %305 = arith.addf %304, %303 : vector<2x128xf32>
    %306 = arith.divf %304, %305 : vector<2x128xf32>
    %307 = vector.extract_strided_slice %294 {offsets = [0, 256], sizes = [2, 128], strides = [1, 1]} : vector<2x512xf32> to vector<2x128xf32>
    %308 = math.tanh %307 : vector<2x128xf32>
    %309 = vector.extract_strided_slice %294 {offsets = [0, 384], sizes = [2, 128], strides = [1, 1]} : vector<2x512xf32> to vector<2x128xf32>
    %310 = arith.negf %309 : vector<2x128xf32>
    %311 = math.exp %310 : vector<2x128xf32>
    %cst_67 = arith.constant 1.000000e+00 : f32
    %312 = vector.broadcast %cst_67 : f32 to vector<2x128xf32>
    %313 = arith.addf %312, %311 : vector<2x128xf32>
    %314 = arith.divf %312, %313 : vector<2x128xf32>
    %315 = arith.mulf %306, %289 : vector<2x128xf32>
    %316 = arith.mulf %300, %308 : vector<2x128xf32>
    %317 = arith.addf %315, %316 : vector<2x128xf32>
    %318 = math.tanh %317 : vector<2x128xf32>
    %319 = arith.mulf %314, %318 : vector<2x128xf32>
    %320 = arith.addi %5, %c6_i32 : i32
    %321 = vector.broadcast %320 : i32 to vector<2x1xi32>
    %322 = arith.cmpi sgt, %3, %321 : vector<2x1xi32>
    %cst_68 = arith.constant 0.000000e+00 : f32
    %323 = vector.shape_cast %322 : vector<2x1xi1> to vector<2x1xi1>
    %324 = vector.broadcast %323 : vector<2x1xi1> to vector<2x128xi1>
    %325 = vector.broadcast %cst_68 : f32 to vector<2x128xf32>
    %326 = arith.select %324, %319, %325 : vector<2x128xi1>, vector<2x128xf32>
    %327 = arith.index_cast %c6_i32 : i32 to index
    %c0_69 = arith.constant 0 : index
    %c0_70 = arith.constant 0 : index
    %328 = vector.load %arg5[%327, %c0_69, %c0_70] : memref<8x2x128xf32, #tpu.memory_space<vmem>>, vector<1x2x128xf32>
    %329 = vector.shape_cast %328 : vector<1x2x128xf32> to vector<2x128xf32>
    %330 = vector.shape_cast %326 : vector<2x128xf32> to vector<1x2x128xf32>
    tpu.vector_store %arg5[%327, %c0_69, %c0_70], %330 {strides = array<i32>} : memref<8x2x128xf32, #tpu.memory_space<vmem>>, vector<1x2x128xf32>,
    %331 = vector.shape_cast %322 : vector<2x1xi1> to vector<2x1xi1>
    %332 = vector.broadcast %331 : vector<2x1xi1> to vector<2x128xi1>
    %333 = arith.select %332, %319, %286 : vector<2x128xi1>, vector<2x128xf32>
    %334 = vector.shape_cast %322 : vector<2x1xi1> to vector<2x1xi1>
    %335 = vector.broadcast %334 : vector<2x1xi1> to vector<2x128xi1>
    %336 = arith.select %335, %317, %289 : vector<2x128xi1>, vector<2x128xf32>
    %c7_i32 = arith.constant 7 : i32
    %337 = arith.index_cast %c7_i32 : i32 to index
    %c0_71 = arith.constant 0 : index
    %c0_72 = arith.constant 0 : index
    %338 = vector.load %arg3[%337, %c0_71, %c0_72] : memref<8x2x512xf32, #tpu.memory_space<vmem>>, vector<1x2x512xf32>
    %339 = vector.shape_cast %338 : vector<1x2x512xf32> to vector<2x512xf32>
    %cst_73 = arith.constant dense<0.000000e+00> : vector<2x512xf32>
    %340 = tpu.matmul %333, %4, %cst_73 {dimension_numbers = #tpu.dot_dimension_numbers<[1], [0], [0], [1], [0, 0, 1, 1], [], []>} : vector<2x128xf32>, vector<128x512xf32>, vector<2x512xf32> -> vector<2x512xf32>
    %341 = arith.addf %339, %340 : vector<2x512xf32>
    %342 = vector.extract_strided_slice %341 {offsets = [0, 0], sizes = [2, 128], strides = [1, 1]} : vector<2x512xf32> to vector<2x128xf32>
    %343 = arith.negf %342 : vector<2x128xf32>
    %344 = math.exp %343 : vector<2x128xf32>
    %cst_74 = arith.constant 1.000000e+00 : f32
    %345 = vector.broadcast %cst_74 : f32 to vector<2x128xf32>
    %346 = arith.addf %345, %344 : vector<2x128xf32>
    %347 = arith.divf %345, %346 : vector<2x128xf32>
    %348 = vector.extract_strided_slice %341 {offsets = [0, 128], sizes = [2, 128], strides = [1, 1]} : vector<2x512xf32> to vector<2x128xf32>
    %349 = arith.negf %348 : vector<2x128xf32>
    %350 = math.exp %349 : vector<2x128xf32>
    %cst_75 = arith.constant 1.000000e+00 : f32
    %351 = vector.broadcast %cst_75 : f32 to vector<2x128xf32>
    %352 = arith.addf %351, %350 : vector<2x128xf32>
    %353 = arith.divf %351, %352 : vector<2x128xf32>
    %354 = vector.extract_strided_slice %341 {offsets = [0, 256], sizes = [2, 128], strides = [1, 1]} : vector<2x512xf32> to vector<2x128xf32>
    %355 = math.tanh %354 : vector<2x128xf32>
    %356 = vector.extract_strided_slice %341 {offsets = [0, 384], sizes = [2, 128], strides = [1, 1]} : vector<2x512xf32> to vector<2x128xf32>
    %357 = arith.negf %356 : vector<2x128xf32>
    %358 = math.exp %357 : vector<2x128xf32>
    %cst_76 = arith.constant 1.000000e+00 : f32
    %359 = vector.broadcast %cst_76 : f32 to vector<2x128xf32>
    %360 = arith.addf %359, %358 : vector<2x128xf32>
    %361 = arith.divf %359, %360 : vector<2x128xf32>
    %362 = arith.mulf %353, %336 : vector<2x128xf32>
    %363 = arith.mulf %347, %355 : vector<2x128xf32>
    %364 = arith.addf %362, %363 : vector<2x128xf32>
    %365 = math.tanh %364 : vector<2x128xf32>
    %366 = arith.mulf %361, %365 : vector<2x128xf32>
    %367 = arith.addi %5, %c7_i32 : i32
    %368 = vector.broadcast %367 : i32 to vector<2x1xi32>
    %369 = arith.cmpi sgt, %3, %368 : vector<2x1xi32>
    %cst_77 = arith.constant 0.000000e+00 : f32
    %370 = vector.shape_cast %369 : vector<2x1xi1> to vector<2x1xi1>
    %371 = vector.broadcast %370 : vector<2x1xi1> to vector<2x128xi1>
    %372 = vector.broadcast %cst_77 : f32 to vector<2x128xf32>
    %373 = arith.select %371, %366, %372 : vector<2x128xi1>, vector<2x128xf32>
    %374 = arith.index_cast %c7_i32 : i32 to index
    %c0_78 = arith.constant 0 : index
    %c0_79 = arith.constant 0 : index
    %375 = vector.load %arg5[%374, %c0_78, %c0_79] : memref<8x2x128xf32, #tpu.memory_space<vmem>>, vector<1x2x128xf32>
    %376 = vector.shape_cast %375 : vector<1x2x128xf32> to vector<2x128xf32>
    %377 = vector.shape_cast %373 : vector<2x128xf32> to vector<1x2x128xf32>
    tpu.vector_store %arg5[%374, %c0_78, %c0_79], %377 {strides = array<i32>} : memref<8x2x128xf32, #tpu.memory_space<vmem>>, vector<1x2x128xf32>,
    %378 = vector.shape_cast %369 : vector<2x1xi1> to vector<2x1xi1>
    %379 = vector.broadcast %378 : vector<2x1xi1> to vector<2x128xi1>
    %380 = arith.select %379, %366, %333 : vector<2x128xi1>, vector<2x128xf32>
    %381 = vector.shape_cast %369 : vector<2x1xi1> to vector<2x1xi1>
    %382 = vector.broadcast %381 : vector<2x1xi1> to vector<2x128xi1>
    %383 = arith.select %382, %364, %336 : vector<2x128xi1>, vector<2x128xf32>
    %c8_i32_80 = arith.constant 8 : i32
    %c0_81 = arith.constant 0 : index
    %c0_82 = arith.constant 0 : index
    %384 = vector.load %arg7[%c0_81, %c0_82] : memref<2x128xf32, #tpu.memory_space<vmem>>, vector<2x128xf32>
    tpu.vector_store %arg7[%c0_81, %c0_82], %380 {strides = array<i32>} : memref<2x128xf32, #tpu.memory_space<vmem>>, vector<2x128xf32>,
    %c0_83 = arith.constant 0 : index
    %c0_84 = arith.constant 0 : index
    %385 = vector.load %arg8[%c0_83, %c0_84] : memref<2x128xf32, #tpu.memory_space<vmem>>, vector<2x128xf32>
    tpu.vector_store %arg8[%c0_83, %c0_84], %383 {strides = array<i32>} : memref<2x128xf32, #tpu.memory_space<vmem>>, vector<2x128xf32>,
    %c0_i32_85 = arith.constant 0 : i32
    %386 = arith.cmpi eq, %arg1, %c0_i32_85 : i32
    %387 = arith.extui %386 : i1 to i32
    %c0_i32_86 = arith.constant 0 : i32
    %388 = arith.cmpi ne, %387, %c0_i32_86 : i32
    scf.if %388 {
      %c0_87 = arith.constant 0 : index
      %c0_88 = arith.constant 0 : index
      %389 = vector.load %arg6[%c0_87, %c0_88] : memref<2x128xf32, #tpu.memory_space<vmem>>, vector<2x128xf32>
      tpu.vector_store %arg6[%c0_87, %c0_88], %380 {strides = array<i32>} : memref<2x128xf32, #tpu.memory_space<vmem>>, vector<2x128xf32>,
    } else {
    }
    return
  }
  func.func @transform_0(%arg0: i32, %arg1: i32) -> (i32, i32) {
    %c0_i32 = arith.constant 0 : i32
    %c0_i32_0 = arith.constant 0 : i32
    return %arg0, %c0_i32 : i32, i32
  }
  func.func @transform_1(%arg0: i32, %arg1: i32) -> (i32, i32, i32) {
    %c0_i32 = arith.constant 0 : i32
    %c0_i32_0 = arith.constant 0 : i32
    return %arg1, %arg0, %c0_i32 : i32, i32, i32
  }
  func.func @transform_2(%arg0: i32, %arg1: i32) -> (i32, i32) {
    %c0_i32 = arith.constant 0 : i32
    %c0_i32_0 = arith.constant 0 : i32
    %c0_i32_1 = arith.constant 0 : i32
    return %c0_i32, %c0_i32_0 : i32, i32
  }
  func.func @transform_3(%arg0: i32, %arg1: i32) -> (i32, i32, i32) {
    %c0_i32 = arith.constant 0 : i32
    %c0_i32_0 = arith.constant 0 : i32
    return %arg1, %arg0, %c0_i32 : i32, i32, i32
  }
  func.func @transform_4(%arg0: i32, %arg1: i32) -> (i32, i32) {
    %c0_i32 = arith.constant 0 : i32
    %c0_i32_0 = arith.constant 0 : i32
    return %arg0, %c0_i32 : i32, i32
  }
}

</mosaic_0001>

<bundles_post_ra>
// kernel: lstm_pallas.1
= control target key start
LH: loop header
LB: loop body
LE: loop exit
PB: predicated region body
PF: predicated region fallthrough
CT: control target
= control target key end

     0   :  { %v3413_v6 = vmov 0.0   ;;  %s3408_s0 = inlined_call_operand.vmem [shape: s32[2,1], index: 0, kind: input, shape index: {}]   ;;  %s3409_s1 = inlined_call_operand.vmem [shape: f32[8,2,512], index: 1, kind: input, shape index: {}]   ;;  %s3410_s2 = inlined_call_operand.vmem [shape: f32[128,512], index: 2, kind: input, shape index: {}]   ;;  %s3411_s3 = inlined_call_operand.vmem [shape: f32[8,2,128], index: 3, kind: output, shape index: {0}]   ;;  %s3412_s4 = inlined_call_operand.hbm [shape: f32[2,128], index: 4, kind: output, shape index: {1}]  }
   0x1   :  { %v2090_v0 = vld [vmem:[%s3410_s2 + $0x1e8] sm:$0xff]  ;;  %v2095_v1 = vld [vmem:[%s3410_s2 + $0x1f8] sm:$0xff]  ;;  %v2100_v2 = vld [vmem:[%s3410_s2 + $0x1e0] sm:$0xff]  ;;  %21 = vst [vmem:[#allocation2] sm:$0x3] %v3413_v6 }
   0x2   :  { %3502 = vst [vmem:[#allocation7_spill] sm:$0xff] %v2090_v0  ;;  %3503 = vst [vmem:[#allocation8_spill] sm:$0xff] %v2095_v1  ;;  %92 = vmatprep.subr.mxu0 %v2090_v0  ;;  %163 = vmatprep.subr.mxu1 %v2095_v1  ;;  %v2107_v3 = vld [vmem:[%s3410_s2 + $0x1f0] sm:$0xff]  ;;  %v2112_v4 = vld [vmem:[%s3410_s2 + $0x1c8] sm:$0xff] }
   0x3   :  { %v2117_v5 = vld [vmem:[%s3410_s2 + $0x1d8] sm:$0xff]  ;;  %22 = vst [vmem:[#allocation3] sm:$0x3] %v3413_v6  ;;  %93 = vmatpush1.msra.mxu0 %v2100_v2  ;;  %164 = vmatpush1.msra.mxu1 %v2107_v3  ;;  %v2126_v7 = vld [vmem:[%s3410_s2 + $0x1c0] sm:$0xff]  ;;  %v2131_v8 = vld [vmem:[%s3410_s2 + $0x1d0] sm:$0xff] }
   0x4   :  { %v2136_v9 = vld [vmem:[%s3410_s2 + $0x1a8] sm:$0xff]  ;;  %94 = vmatprep.subr.mxu0 %v2112_v4  ;;  %165 = vmatprep.subr.mxu1 %v2117_v5  ;;  %v2143_v10 = vld [vmem:[%s3410_s2 + $0x1b8] sm:$0xff]  ;;  %v2148_v11 = vld [vmem:[%s3410_s2 + $0x1a0] sm:$0xff] }
   0x5   :  { %v2153_v12 = vld [vmem:[%s3410_s2 + $0x1b0] sm:$0xff]  ;;  %95 = vmatpush1.msra.mxu0 %v2126_v7  ;;  %166 = vmatpush1.msra.mxu1 %v2131_v8  ;;  %v2160_v13 = vld [vmem:[%s3410_s2 + $0x188] sm:$0xff]  ;;  %v2165_v14 = vld [vmem:[%s3410_s2 + $0x198] sm:$0xff] }
   0x6   :  { %96 = vmatprep.subr.mxu0 %v2136_v9  ;;  %167 = vmatprep.subr.mxu1 %v2143_v10  ;;  %v2172_v15 = vld [vmem:[%s3410_s2 + $0x180] sm:$0xff]  ;;  %v2177_v16 = vld [vmem:[%s3410_s2 + $0x190] sm:$0xff]  ;;  %v2184_v17 = vld [vmem:[%s3410_s2 + $0x168] sm:$0xff] }
   0x7   :  { %97 = vmatpush1.msra.mxu0 %v2148_v11  ;;  %168 = vmatpush1.msra.mxu1 %v2153_v12  ;;  %v2189_v18 = vld [vmem:[%s3410_s2 + $0x178] sm:$0xff]  ;;  %v2196_v19 = vld [vmem:[%s3410_s2 + $0x160] sm:$0xff]  ;;  %v2201_v20 = vld [vmem:[%s3410_s2 + $0x170] sm:$0xff] }
   0x8   :  { %98 = vmatprep.subr.mxu0 %v2160_v13  ;;  %169 = vmatprep.subr.mxu1 %v2165_v14  ;;  %v2208_v21 = vld [vmem:[%s3410_s2 + $0x148] sm:$0xff]  ;;  %v2213_v22 = vld [vmem:[%s3410_s2 + $0x158] sm:$0xff]  ;;  %v2220_v23 = vld [vmem:[%s3410_s2 + $0x140] sm:$0xff] }
   0x9   :  { %99 = vmatpush1.msra.mxu0 %v2172_v15  ;;  %170 = vmatpush1.msra.mxu1 %v2177_v16  ;;  %v2225_v24 = vld [vmem:[%s3410_s2 + $0x150] sm:$0xff]  ;;  %v2232_v25 = vld [vmem:[%s3410_s2 + $0x128] sm:$0xff]  ;;  %v2237_v26 = vld [vmem:[%s3410_s2 + $0x138] sm:$0xff] }
   0xa   :  { %100 = vmatprep.subr.mxu0 %v2184_v17  ;;  %171 = vmatprep.subr.mxu1 %v2189_v18  ;;  %v2244_v27 = vld [vmem:[%s3410_s2 + $0x120] sm:$0xff]  ;;  %v2249_v28 = vld [vmem:[%s3410_s2 + $0x130] sm:$0xff]  ;;  %v2256_v29 = vld [vmem:[%s3410_s2 + $0x108] sm:$0xff] }
   0xb   :  { %101 = vmatpush1.msra.mxu0 %v2196_v19  ;;  %172 = vmatpush1.msra.mxu1 %v2201_v20  ;;  %v2261_v30 = vld [vmem:[%s3410_s2 + $0x118] sm:$0xff]  ;;  %v2268_v31 = vld [vmem:[%s3410_s2 + $0x100] sm:$0xff]  ;;  %v2273_v32 = vld [vmem:[%s3410_s2 + $0x110] sm:$0xff] }
   0xc   :  { %102 = vmatprep.subr.mxu0 %v2208_v21  ;;  %173 = vmatprep.subr.mxu1 %v2213_v22  ;;  %v2280_v33 = vld [vmem:[%s3410_s2 + $0xe8] sm:$0xff]  ;;  %v2285_v34 = vld [vmem:[%s3410_s2 + $0xf8] sm:$0xff]  ;;  %v2292_v35 = vld [vmem:[%s3410_s2 + $0xe0] sm:$0xff] }
   0xd   :  { %103 = vmatpush1.msra.mxu0 %v2220_v23  ;;  %174 = vmatpush1.msra.mxu1 %v2225_v24  ;;  %v2297_v36 = vld [vmem:[%s3410_s2 + $0xf0] sm:$0xff]  ;;  %v2304_v37 = vld [vmem:[%s3410_s2 + $0xc8] sm:$0xff]  ;;  %v2309_v38 = vld [vmem:[%s3410_s2 + $0xd8] sm:$0xff] }
   0xe   :  { %104 = vmatprep.subr.mxu0 %v2232_v25  ;;  %175 = vmatprep.subr.mxu1 %v2237_v26  ;;  %v2316_v39 = vld [vmem:[%s3410_s2 + $0xc0] sm:$0xff]  ;;  %v2321_v40 = vld [vmem:[%s3410_s2 + $0xd0] sm:$0xff]  ;;  %v2328_v41 = vld [vmem:[%s3410_s2 + $0xa8] sm:$0xff] }
   0xf   :  { %105 = vmatpush1.msra.mxu0 %v2244_v27  ;;  %176 = vmatpush1.msra.mxu1 %v2249_v28  ;;  %v2333_v42 = vld [vmem:[%s3410_s2 + $0xb8] sm:$0xff]  ;;  %v2340_v43 = vld [vmem:[%s3410_s2 + $0xa0] sm:$0xff]  ;;  %v2345_v44 = vld [vmem:[%s3410_s2 + $0xb0] sm:$0xff] }
  0x10   :  { %106 = vmatprep.subr.mxu0 %v2256_v29  ;;  %177 = vmatprep.subr.mxu1 %v2261_v30  ;;  %v2352_v45 = vld [vmem:[%s3410_s2 + $0x88] sm:$0xff]  ;;  %v2357_v46 = vld [vmem:[%s3410_s2 + $0x98] sm:$0xff]  ;;  %v2364_v47 = vld [vmem:[%s3410_s2 + $0x80] sm:$0xff] }
  0x11   :  { %107 = vmatpush1.msra.mxu0 %v2268_v31  ;;  %178 = vmatpush1.msra.mxu1 %v2273_v32  ;;  %3504 = vst [vmem:[#allocation9_spill] sm:$0xff] %v2364_v47  ;;  %v2369_v48 = vld [vmem:[%s3410_s2 + $0x90] sm:$0xff]  ;;  %v2376_v49 = vld [vmem:[%s3410_s2 + $0x68] sm:$0xff]  ;;  %v2381_v50 = vld [vmem:[%s3410_s2 + $0x78] sm:$0xff] }
  0x12   :  { %108 = vmatprep.subr.mxu0 %v2280_v33  ;;  %179 = vmatprep.subr.mxu1 %v2285_v34  ;;  %3505 = vst [vmem:[#allocation10_spill] sm:$0xff] %v2369_v48  ;;  %3506 = vst [vmem:[#allocation11_spill] sm:$0xff] %v2376_v49 }
  0x13   :  { %109 = vmatpush1.msra.mxu0 %v2292_v35  ;;  %180 = vmatpush1.msra.mxu1 %v2297_v36  ;;  %3507 = vst [vmem:[#allocation12_spill] sm:$0xff] %v2381_v50 }
  0x14   :  { %110 = vmatprep.subr.mxu0 %v2304_v37  ;;  %181 = vmatprep.subr.mxu1 %v2309_v38 }
  0x15   :  { %111 = vmatpush1.msra.mxu0 %v2316_v39  ;;  %182 = vmatpush1.msra.mxu1 %v2321_v40 }
  0x16   :  { %112 = vmatprep.subr.mxu0 %v2328_v41  ;;  %183 = vmatprep.subr.mxu1 %v2333_v42 }
  0x17   :  { %113 = vmatpush1.msra.mxu0 %v2340_v43  ;;  %184 = vmatpush1.msra.mxu1 %v2345_v44 }
  0x18   :  { %10 = vsyncpa [#allocation5], 0  ;;  %114 = vmatprep.subr.mxu0 %v2352_v45  ;;  %185 = vmatprep.subr.mxu1 %v2357_v46  ;;  %v2388_v51 = vld [vmem:[%s3410_s2 + $0x60] sm:$0xff]  ;;  %v2393_v52 = vld [vmem:[%s3410_s2 + $0x70] sm:$0xff] }
  0x19   :  { %3508 = vst [vmem:[#allocation13_spill] sm:$0xff] %v2388_v51  ;;  %3509 = vst [vmem:[#allocation14_spill] sm:$0xff] %v2393_v52  ;;  %115 = vmatpush1.msra.mxu0 %v2364_v47  ;;  %186 = vmatpush1.msra.mxu1 %v2369_v48  ;;  %v2400_v53 = vld [vmem:[%s3410_s2 + $0x48] sm:$0xff]  ;;  %v2405_v54 = vld [vmem:[%s3410_s2 + $0x58] sm:$0xff] }
  0x1a   :  { %3510 = vst [vmem:[#allocation15_spill] sm:$0xff] %v2400_v53  ;;  %3511 = vst [vmem:[#allocation16_spill] sm:$0xff] %v2405_v54  ;;  %116 = vmatprep.subr.mxu0 %v2376_v49  ;;  %187 = vmatprep.subr.mxu1 %v2381_v50  ;;  %v2412_v55 = vld [vmem:[%s3410_s2 + $0x40] sm:$0xff]  ;;  %v2417_v56 = vld [vmem:[%s3410_s2 + $0x50] sm:$0xff] }
  0x1b   :  { %3512 = vst [vmem:[#allocation17_spill] sm:$0xff] %v2412_v55  ;;  %3513 = vst [vmem:[#allocation18_spill] sm:$0xff] %v2417_v56  ;;  %117 = vmatpush1.msra.mxu0 %v2388_v51  ;;  %188 = vmatpush1.msra.mxu1 %v2393_v52  ;;  %v2424_v57 = vld [vmem:[%s3410_s2 + $0x28] sm:$0xff]  ;;  %v2429_v58 = vld [vmem:[%s3410_s2 + $0x38] sm:$0xff] }
  0x1c   :  { %3514 = vst [vmem:[#allocation19_spill] sm:$0xff] %v2424_v57  ;;  %3515 = vst [vmem:[#allocation20_spill] sm:$0xff] %v2429_v58  ;;  %118 = vmatprep.subr.mxu0 %v2400_v53  ;;  %189 = vmatprep.subr.mxu1 %v2405_v54  ;;  %v2436_v59 = vld [vmem:[%s3410_s2 + $0x20] sm:$0xff]  ;;  %v2441_v60 = vld [vmem:[%s3410_s2 + $0x30] sm:$0xff] }
  0x1d   :  { %3516 = vst [vmem:[#allocation21_spill] sm:$0xff] %v2436_v59  ;;  %3517 = vst [vmem:[#allocation22_spill] sm:$0xff] %v2441_v60  ;;  %v2446_v61 = vld [vmem:[%s3408_s0] sm:$0x3]  ;;  %119 = vmatpush1.msra.mxu0 %v2412_v55  ;;  %190 = vmatpush1.msra.mxu1 %v2417_v56  ;;  %v2453_v62 = vld [vmem:[%s3410_s2 + $0x8] sm:$0xff] }
  0x1e   :  { %3518 = vst [vmem:[#allocation23_spill] sm:$0xff] %v2446_v61  ;;  %3519 = vst [vmem:[#allocation24_spill] sm:$0xff] %v2453_v62  ;;  %v2458_v63 = vld [vmem:[%s3410_s2 + $0x18] sm:$0xff]  ;;  %120 = vmatprep.subr.mxu0 %v2424_v57  ;;  %191 = vmatprep.subr.mxu1 %v2429_v58  ;;  %v2465_v6 = vld [vmem:[%s3410_s2] sm:$0xff]  ;;  %vm289_vm0 = vcmp.gt.s32.totalorder %v2446_v61, 0  ;;  %v3523_v57 = vmov 0.0  }
  0x1f   :  { %3520 = vst [vmem:[#allocation25_spill] sm:$0xff] %v2458_v63  ;;  %3521 = vst [vmem:[#allocation26_spill] sm:$0xff] %v2465_v6  ;;  %121 = vmatpush1.msra.mxu0 %v2436_v59  ;;  %192 = vmatpush1.msra.mxu1 %v2441_v60  ;;  %v2472_v56 = vld [vmem:[%s3410_s2 + $0x10] sm:$0xff]  ;;  %v2477_v58 = vld [vmem:[#allocation2] sm:$0x3]  ;;  %v3427_v60 = vmov 0  }
  0x20   :  { %3522 = vst [vmem:[#allocation27_spill] sm:$0xff] %v2472_v56  ;;  %122 = vmatprep.subr.mxu0 %v2453_v62  ;;  %193 = vmatprep.subr.mxu1 %v2458_v63  ;;  %v290_v59 = vsel %vm289_vm0, 1, %v3427_v60  ;;  %vm499_vm1 = vcmp.gt.s32.totalorder %v2446_v61, 1  ;;  %vm1132_vm2 = vcmp.gt.s32.totalorder %v2446_v61, 4  ;;  %vm1554_vm3 = vcmp.gt.s32.totalorder %v2446_v61, 6 }
  0x21   :  { %123 = vmatpush1.msra.mxu0 %v2465_v6  ;;  %156 = vmatprep.mubr.f32.mxu0 %v3523_v57 }
  0x22   :  { %194 = vmatpush1.msra.mxu1 %v2472_v56  ;;  %227 = vmatprep.mubr.f32.mxu1 %v3523_v57  ;;  %v500_v56 = vsel %vm499_vm1, 1, %v3427_v60 }
  0x23   :  { %157 = vmatmul.mubr.f32.vlgmr.msra.gmra.mxu0 %v2477_v58  ;;  %228 = vmatmul.mubr.f32.vlgmr.msra.gmra.mxu1 %v2477_v58 }
  0x24   :  { %1842 = vset.pattern.permute.xlu0 %v3427_v60  ;;  %301 = vmatprep.subr.mxu0 %v2090_v0  ;;  %v3527_v61 = vld [vmem:[#allocation21_spill] sm:$0xff] }
  0x25   :  { %292 = vperm.xlu0 %1842, %v290_v59   ;;  %372 = vmatprep.subr.mxu1 %v2095_v1  ;;  %v1133_v59 = vsel %vm1132_vm2, 1, %v3427_v60 }
  0x26   :  { %302 = vmatpush1.msra.mxu0 %v2100_v2  ;;  %373 = vmatpush1.msra.mxu1 %v2107_v3 }
  0x27   :  { %303 = vmatprep.subr.mxu0 %v2112_v4  ;;  %374 = vmatprep.subr.mxu1 %v2117_v5 }
  0x28   :  { %304 = vmatpush1.msra.mxu0 %v2126_v7  ;;  %375 = vmatpush1.msra.mxu1 %v2131_v8 }
  0x29   :  { %502 = vperm.xlu0 %1842, %v500_v56   ;;  %305 = vmatprep.subr.mxu0 %v2136_v9  ;;  %v1555_v56 = vsel %vm1554_vm3, 1, %v3427_v60  ;;  %v3526_v60 = vld [vmem:[#allocation20_spill] sm:$0xff] }
  0x2a   :  { %376 = vmatprep.subr.mxu1 %v2143_v10  ;;  %306 = vmatpush1.msra.mxu0 %v2148_v11 }
  0x2b   :  { %377 = vmatpush1.msra.mxu1 %v2153_v12  ;;  %307 = vmatprep.subr.mxu0 %v2160_v13 }
  0x2c   :  { %378 = vmatprep.subr.mxu1 %v2165_v14  ;;  %308 = vmatpush1.msra.mxu0 %v2172_v15 }
  0x2d   :  { %1135 = vperm.xlu0 %1842, %v1133_v59   ;;  %379 = vmatpush1.msra.mxu1 %v2177_v16  ;;  %v3524_v59 = vld [vmem:[#allocation18_spill] sm:$0xff] }
  0x2e   :  { %309 = vmatprep.subr.mxu0 %v2184_v17  ;;  %380 = vmatprep.subr.mxu1 %v2189_v18 }
  0x2f   :  { %310 = vmatpush1.msra.mxu0 %v2196_v19  ;;  %381 = vmatpush1.msra.mxu1 %v2201_v20 }
  0x30   :  { %311 = vmatprep.subr.mxu0 %v2208_v21  ;;  %382 = vmatprep.subr.mxu1 %v2213_v22 }
  0x31   :  { %1557 = vperm.xlu0 %1842, %v1555_v56   ;;  %312 = vmatpush1.msra.mxu0 %v2220_v23  ;;  %v3525_v56 = vld [vmem:[#allocation19_spill] sm:$0xff] }
  0x32   :  { %383 = vmatpush1.msra.mxu1 %v2225_v24  ;;  %313 = vmatprep.subr.mxu0 %v2232_v25 }
  0x33   :  { %384 = vmatprep.subr.mxu1 %v2237_v26  ;;  %314 = vmatpush1.msra.mxu0 %v2244_v27 }
  0x34   :  { %385 = vmatpush1.msra.mxu1 %v2249_v28  ;;  %315 = vmatprep.subr.mxu0 %v2256_v29 }
  0x35   :  { %386 = vmatprep.subr.mxu1 %v2261_v30  ;;  %316 = vmatpush1.msra.mxu0 %v2268_v31 }
  0x36   :  { %387 = vmatpush1.msra.mxu1 %v2273_v32  ;;  %317 = vmatprep.subr.mxu0 %v2280_v33 }
  0x37   :  { %388 = vmatprep.subr.mxu1 %v2285_v34  ;;  %318 = vmatpush1.msra.mxu0 %v2292_v35 }
  0x38   :  { %389 = vmatpush1.msra.mxu1 %v2297_v36  ;;  %319 = vmatprep.subr.mxu0 %v2304_v37 }
  0x39   :  { %390 = vmatprep.subr.mxu1 %v2309_v38  ;;  %320 = vmatpush1.msra.mxu0 %v2316_v39 }
  0x3a   :  { %391 = vmatpush1.msra.mxu1 %v2321_v40  ;;  %321 = vmatprep.subr.mxu0 %v2328_v41 }
  0x3b   :  { %392 = vmatprep.subr.mxu1 %v2333_v42  ;;  %322 = vmatpush1.msra.mxu0 %v2340_v43 }
  0x3c   :  { %393 = vmatpush1.msra.mxu1 %v2345_v44  ;;  %323 = vmatprep.subr.mxu0 %v2352_v45 }
  0x3d   :  { %394 = vmatprep.subr.mxu1 %v2357_v46  ;;  %324 = vmatpush1.msra.mxu0 %v2364_v47 }
  0x3e   :  { %395 = vmatpush1.msra.mxu1 %v2369_v48  ;;  %325 = vmatprep.subr.mxu0 %v2376_v49  ;;  %v3528_v49 = vld [vmem:[#allocation22_spill] sm:$0xff] }
  0x3f   :  { %396 = vmatprep.subr.mxu1 %v2381_v50  ;;  %326 = vmatpush1.msra.mxu0 %v2388_v51 }
  0x40   :  { %397 = vmatpush1.msra.mxu1 %v2393_v52  ;;  %327 = vmatprep.subr.mxu0 %v2400_v53 }
  0x41   :  { %398 = vmatprep.subr.mxu1 %v2405_v54  ;;  %328 = vmatpush1.msra.mxu0 %v2412_v55  ;;  %v3529_v54 = vld [vmem:[#allocation27_spill] sm:$0xff] }
  0x42   :  { %399 = vmatpush1.msra.mxu1 %v3524_v59  ;;  %329 = vmatprep.subr.mxu0 %v3525_v56  ;;  %v243_v56 = vlaneseq }
  0x43   :  { %400 = vmatprep.subr.mxu1 %v3526_v60  ;;  %330 = vmatpush1.msra.mxu0 %v3527_v61  ;;  %v3530_v60 = vmov 0   ;;  %v2060_v61 = vmov 1983009808  }
  0x44   :  { %401 = vmatpush1.msra.mxu1 %v3528_v49  ;;  %331 = vmatprep.subr.mxu0 %v2453_v62  ;;  %v241_v49 = vunpack.c.l.s4 %v2060_v61  ;;  %v244_v59 = vshrl.u32 %v243_v56, 7 }
  0x45   :  { %402 = vmatprep.subr.mxu1 %v2458_v63  ;;  %332 = vmatpush1.msra.mxu0 %v2465_v6 }
  0x46   :  { %365 = vmatprep.mubr.f32.mxu0 %v3523_v57  ;;  %403 = vmatpush1.msra.mxu1 %v3529_v54  ;;  %v242_v62 = vunpack.c.0.s8 %v241_v49 }
  0x47   :  { %436 = vmatprep.mubr.f32.mxu1 %v3523_v57  ;;  %512 = vmatprep.subr.mxu0 %v2090_v0 }
  0x48   :  { %583 = vmatprep.subr.mxu1 %v2095_v1  ;;  %1843 = vset.pattern.permute.xlu1 %v3530_v60  ;;  %v2562_v6 = vsub.s32 %v242_v62, %v244_v59  ;;  %v91_v60 = vld [vmem:[%s3409_s1] sm:$0xff] }
  0xe3   :  { %v158_v63 = vpop.f32.mrf.mxu0  ;;  %v229_v55 = vpop.f32.mrf.mxu1 }
  0xe5   :  { %v160_v53 = vpop.f32.mrf.mxu0  ;;  %v231_v52 = vpop.f32.mrf.mxu1 }
  0xe6   :  { %v238_v54 = vcombine.low %v158_v63, %v160_v53  ;;  %v239_v51 = vcombine.low %v229_v55, %v231_v52 }
  0xe8   :  { %v246_v57 = vrot.slane %v238_v54, %v2562_v6  ;;  %v253_v0 = vrot.slane %v239_v51, %v2562_v6 }
  0xea   :  { %v254_v61 = vcombine.low %v246_v57, %v253_v0  ;;  %v90_v0 = vld [vmem:[#allocation3] sm:$0x3] }
  0xec   :  { %v256_v1 = vadd.f32 %v254_v61, %v91_v60  ;;  %v293_v60 = vpop.permute.xlu0 %292 }
  0xed   :  { %vm294_vm4 = vcmp.eq.s32.totalorder %v293_v60, 1  ;;  %v3537_v60 = vld [vmem:[#allocation16_spill] sm:$0xff] }
  0xee   :  { %v1800_v49 = vmul.f32 -1.442695, %v256_v1  ;;  %v264_v56 = vrot.slane %v256_v1, 2  ;;  %v275_v62 = vrot.slane %v256_v1, 6  ;;  %v272_v53 = vrot.slane %v256_v1, 4 }
  0xf0   :  { %1844 = vpow2.f32 %v1800_v49  ;;  %v1801_v50 = vmul.f32 -1.442695, %v264_v56  ;;  %v1802_v59 = vmul.f32 -1.442695, %v275_v62 }
  0xf2   :  { %1846 = vpow2.f32 %v1801_v50 }
  0xf3   :  { %1848 = vpow2.f32 %v1802_v59 }
  0xfd   :  { %v1845_v48 = vpop.eup %1844 }
  0xfe   :  { %v260_v52 = vadd.f32 1.0, %v1845_v48 }
  0xff   :  { %v1847_v55 = vpop.eup %1846 }
 0x100   :  { %1850 = vrcp.f32 %v260_v52  ;;  %v269_v51 = vadd.f32 1.0, %v1847_v55  ;;  %v1849_v54 = vpop.eup %1848 }
 0x101   :  { %1852 = vtanh.f32 %v272_v53  ;;  %v280_v49 = vadd.f32 1.0, %v1849_v54  ;;  %v3533_v54 = vld [vmem:[#allocation12_spill] sm:$0xff] }
 0x102   :  { %1854 = vrcp.f32 %v269_v51  ;;  %v3532_v51 = vld [vmem:[#allocation11_spill] sm:$0xff] }
 0x103   :  { %1856 = vrcp.f32 %v280_v49  ;;  %v3539_v49 = vld [vmem:[#allocation18_spill] sm:$0xff] }
 0x10d   :  { %v1851_v63 = vpop.eup %1850 }
 0x10e   :  { %v1853_v57 = vpop.eup %1852 }
 0x10f   :  { %v1855_v61 = vpop.eup %1854  ;;  %v284_v50 = vmul.f32 %v1853_v57, %v1851_v63  ;;  %v3534_v63 = vld [vmem:[#allocation13_spill] sm:$0xff]  ;;  %v3536_v57 = vld [vmem:[#allocation15_spill] sm:$0xff] }
 0x110   :  { %v283_v56 = vmul.f32 %v1855_v61, %v90_v0  ;;  %v1857_v48 = vpop.eup %1856  ;;  %v3538_v61 = vld [vmem:[#allocation17_spill] sm:$0xff] }
 0x112   :  { %v285_v62 = vadd.f32 %v284_v50, %v283_v56  ;;  %v3540_v56 = vld [vmem:[#allocation19_spill] sm:$0xff]  ;;  %v3541_v50 = vld [vmem:[#allocation20_spill] sm:$0xff] }
 0x114   :  { %1858 = vtanh.f32 %v285_v62  ;;  %v2569_v1 = vsel %vm294_vm4, %v285_v62, %v90_v0  ;;  %v3535_v0 = vld [vmem:[#allocation14_spill] sm:$0xff]  ;;  %v3542_v62 = vld [vmem:[#allocation21_spill] sm:$0xff] }
 0x121   :  { %v1859_v59 = vpop.eup %1858 }
 0x122   :  { %v287_v52 = vmul.f32 %v1859_v59, %v1857_v48  ;;  %v3543_v48 = vld [vmem:[#allocation22_spill] sm:$0xff]  ;;  %v3544_v59 = vld [vmem:[#allocation24_spill] sm:$0xff] }
 0x124   :  { %v295_v53 = vsel %vm294_vm4, %v287_v52, 0.0  ;;  %v2572_v55 = vsel %vm294_vm4, %v287_v52, %v2477_v58  ;;  %v3531_v58 = vld [vmem:[#allocation10_spill] sm:$0xff]  ;;  %v3545_v52 = vld [vmem:[#allocation25_spill] sm:$0xff] }
 0x125   :  { %296 = vst [vmem:[%s3411_s3] sm:$0x3] %v295_v53  ;;  %366 = vmatmul.mubr.f32.vlgmr.msra.gmra.mxu0 %v2572_v55  ;;  %437 = vmatmul.mubr.f32.vlgmr.msra.gmra.mxu1 %v2572_v55  ;;  %v3546_v53 = vld [vmem:[#allocation26_spill] sm:$0xff] }
 0x126   :  { %513 = vmatpush1.msra.mxu0 %v2100_v2  ;;  %584 = vmatpush1.msra.mxu1 %v2107_v3 }
 0x127   :  { %514 = vmatprep.subr.mxu0 %v2112_v4  ;;  %585 = vmatprep.subr.mxu1 %v2117_v5 }
 0x128   :  { %515 = vmatpush1.msra.mxu0 %v2126_v7  ;;  %586 = vmatpush1.msra.mxu1 %v2131_v8 }
 0x129   :  { %516 = vmatprep.subr.mxu0 %v2136_v9  ;;  %587 = vmatprep.subr.mxu1 %v2143_v10 }
 0x12a   :  { %517 = vmatpush1.msra.mxu0 %v2148_v11  ;;  %588 = vmatpush1.msra.mxu1 %v2153_v12 }
 0x12b   :  { %518 = vmatprep.subr.mxu0 %v2160_v13  ;;  %589 = vmatprep.subr.mxu1 %v2165_v14 }
 0x12c   :  { %519 = vmatpush1.msra.mxu0 %v2172_v15  ;;  %590 = vmatpush1.msra.mxu1 %v2177_v16 }
 0x12d   :  { %520 = vmatprep.subr.mxu0 %v2184_v17  ;;  %591 = vmatprep.subr.mxu1 %v2189_v18 }
 0x12e   :  { %521 = vmatpush1.msra.mxu0 %v2196_v19  ;;  %592 = vmatpush1.msra.mxu1 %v2201_v20 }
 0x12f   :  { %522 = vmatprep.subr.mxu0 %v2208_v21  ;;  %593 = vmatprep.subr.mxu1 %v2213_v22 }
 0x130   :  { %523 = vmatpush1.msra.mxu0 %v2220_v23  ;;  %594 = vmatpush1.msra.mxu1 %v2225_v24 }
 0x131   :  { %524 = vmatprep.subr.mxu0 %v2232_v25  ;;  %595 = vmatprep.subr.mxu1 %v2237_v26 }
 0x132   :  { %525 = vmatpush1.msra.mxu0 %v2244_v27  ;;  %596 = vmatpush1.msra.mxu1 %v2249_v28 }
 0x133   :  { %526 = vmatprep.subr.mxu0 %v2256_v29  ;;  %597 = vmatprep.subr.mxu1 %v2261_v30 }
 0x134   :  { %527 = vmatpush1.msra.mxu0 %v2268_v31  ;;  %598 = vmatpush1.msra.mxu1 %v2273_v32 }
 0x135   :  { %528 = vmatprep.subr.mxu0 %v2280_v33  ;;  %599 = vmatprep.subr.mxu1 %v2285_v34 }
 0x136   :  { %529 = vmatpush1.msra.mxu0 %v2292_v35  ;;  %600 = vmatpush1.msra.mxu1 %v2297_v36 }
 0x137   :  { %530 = vmatprep.subr.mxu0 %v2304_v37  ;;  %601 = vmatprep.subr.mxu1 %v2309_v38 }
 0x138   :  { %531 = vmatpush1.msra.mxu0 %v2316_v39  ;;  %602 = vmatpush1.msra.mxu1 %v2321_v40 }
 0x139   :  { %532 = vmatprep.subr.mxu0 %v2328_v41  ;;  %603 = vmatprep.subr.mxu1 %v2333_v42 }
 0x13a   :  { %533 = vmatpush1.msra.mxu0 %v2340_v43  ;;  %604 = vmatpush1.msra.mxu1 %v2345_v44 }
 0x13b   :  { %534 = vmatprep.subr.mxu0 %v2352_v45  ;;  %605 = vmatprep.subr.mxu1 %v2357_v46 }
 0x13c   :  { %535 = vmatpush1.msra.mxu0 %v2364_v47  ;;  %606 = vmatpush1.msra.mxu1 %v3531_v58 }
 0x13d   :  { %536 = vmatprep.subr.mxu0 %v3532_v51  ;;  %607 = vmatprep.subr.mxu1 %v3533_v54 }
 0x13e   :  { %537 = vmatpush1.msra.mxu0 %v3534_v63  ;;  %608 = vmatpush1.msra.mxu1 %v3535_v0 }
 0x13f   :  { %538 = vmatprep.subr.mxu0 %v3536_v57  ;;  %609 = vmatprep.subr.mxu1 %v3537_v60  ;;  %v3547_v57 = vmov 0.0   ;;  %v3548_v60 = vld [vmem:[#allocation27_spill] sm:$0xff] }
 0x140   :  { %539 = vmatpush1.msra.mxu0 %v3538_v61  ;;  %610 = vmatpush1.msra.mxu1 %v3539_v49  ;;  %v3549_v49 = vld [vmem:[#allocation7_spill] sm:$0xff] }
 0x141   :  { %540 = vmatprep.subr.mxu0 %v3540_v56  ;;  %611 = vmatprep.subr.mxu1 %v3541_v50  ;;  %v3550_v56 = vld [vmem:[#allocation8_spill] sm:$0xff]  ;;  %v3551_v50 = vld [vmem:[#allocation23_spill] sm:$0xff] }
 0x142   :  { %541 = vmatpush1.msra.mxu0 %v3542_v62  ;;  %612 = vmatpush1.msra.mxu1 %v3543_v48  ;;  %vm710_vm5 = vcmp.gt.s32.totalorder %v3551_v50, 2  ;;  %vm921_vm6 = vcmp.gt.s32.totalorder %v3551_v50, 3  ;;  %v3552_v48 = vmov 0   ;;  %vm1343_vm7 = vcmp.gt.s32.totalorder %v3551_v50, 5 }
 0x143   :  { %542 = vmatprep.subr.mxu0 %v3544_v59  ;;  %613 = vmatprep.subr.mxu1 %v3545_v52  ;;  %v711_v59 = vsel %vm710_vm5, 1, %v3552_v48  ;;  %v922_v52 = vsel %vm921_vm6, 1, %v3552_v48  ;;  %vm1765_vm8 = vcmp.gt.s32.totalorder %v3551_v50, 7 }
 0x144   :  { %543 = vmatpush1.msra.mxu0 %v3546_v53  ;;  %576 = vmatprep.mubr.f32.mxu0 %v3547_v57 }
 0x145   :  { %614 = vmatpush1.msra.mxu1 %v3548_v60  ;;  %647 = vmatprep.mubr.f32.mxu1 %v3547_v57  ;;  %v1344_v60 = vsel %vm1343_vm7, 1, %v3552_v48 }
 0x146   :  { %723 = vmatprep.subr.mxu0 %v3549_v49  ;;  %794 = vmatprep.subr.mxu1 %v3550_v56  ;;  %v1766_v49 = vsel %vm1765_vm8, 1, %v3552_v48 }
 0x147   :  { %713 = vperm.xlu1 %1843, %v711_v59  }
 0x14b   :  { %924 = vperm.xlu1 %1843, %v922_v52   ;;  %v1803_v52 = vld [vmem:[%s3409_s1 + $0x8] sm:$0xff] }
 0x14f   :  { %1346 = vperm.xlu1 %1843, %v1344_v60  }
 0x153   :  { %1768 = vperm.xlu1 %1843, %v1766_v49  }
 0x1e5   :  { %v367_v56 = vpop.f32.mrf.mxu0  ;;  %v438_v57 = vpop.f32.mrf.mxu1 }
 0x1e7   :  { %v369_v53 = vpop.f32.mrf.mxu0  ;;  %v440_v62 = vpop.f32.mrf.mxu1 }
 0x1e8   :  { %v447_v61 = vcombine.low %v367_v56, %v369_v53  ;;  %v448_v0 = vcombine.low %v438_v57, %v440_v62 }
 0x1ea   :  { %v455_v59 = vrot.slane %v447_v61, %v2562_v6  ;;  %v462_v63 = vrot.slane %v448_v0, %v2562_v6 }
 0x1ec   :  { %v463_v54 = vcombine.low %v455_v59, %v462_v63 }
 0x1ee   :  { %v465_v50 = vadd.f32 %v1803_v52, %v463_v54 }
 0x1f0   :  { %v1804_v60 = vmul.f32 -1.442695, %v465_v50  ;;  %v473_v51 = vrot.slane %v465_v50, 2  ;;  %v484_v48 = vrot.slane %v465_v50, 6  ;;  %v481_v56 = vrot.slane %v465_v50, 4 }
 0x1f2   :  { %1860 = vpow2.f32 %v1804_v60  ;;  %v1805_v49 = vmul.f32 -1.442695, %v473_v51  ;;  %v1806_v58 = vmul.f32 -1.442695, %v484_v48  ;;  %v503_v60 = vpop.permute.xlu0 %502 }
 0x1f3   :  { %vm504_vm9 = vcmp.eq.s32.totalorder %v503_v60, 1  ;;  %v3565_v60 = vld [vmem:[#allocation21_spill] sm:$0xff] }
 0x1f4   :  { %1862 = vpow2.f32 %v1805_v49 }
 0x1f5   :  { %1864 = vpow2.f32 %v1806_v58 }
 0x1ff   :  { %v1861_v47 = vpop.eup %1860 }
 0x200   :  { %v469_v57 = vadd.f32 1.0, %v1861_v47 }
 0x201   :  { %v1863_v62 = vpop.eup %1862 }
 0x202   :  { %1866 = vrcp.f32 %v469_v57  ;;  %v478_v0 = vadd.f32 1.0, %v1863_v62  ;;  %v1865_v61 = vpop.eup %1864  ;;  %v3556_v62 = vld [vmem:[#allocation12_spill] sm:$0xff] }
 0x203   :  { %1868 = vtanh.f32 %v481_v56  ;;  %v489_v59 = vadd.f32 1.0, %v1865_v61  ;;  %v3558_v61 = vld [vmem:[#allocation14_spill] sm:$0xff] }
 0x204   :  { %1870 = vrcp.f32 %v478_v0  ;;  %v3557_v0 = vld [vmem:[#allocation13_spill] sm:$0xff] }
 0x205   :  { %1872 = vrcp.f32 %v489_v59  ;;  %v3562_v59 = vld [vmem:[#allocation18_spill] sm:$0xff] }
 0x20f   :  { %v1867_v53 = vpop.eup %1866 }
 0x210   :  { %v1869_v63 = vpop.eup %1868 }
 0x211   :  { %v1871_v54 = vpop.eup %1870  ;;  %v493_v51 = vmul.f32 %v1869_v63, %v1867_v53  ;;  %v3559_v53 = vld [vmem:[#allocation15_spill] sm:$0xff]  ;;  %v3560_v63 = vld [vmem:[#allocation16_spill] sm:$0xff] }
 0x212   :  { %v492_v52 = vmul.f32 %v1871_v54, %v2569_v1  ;;  %v1873_v58 = vpop.eup %1872  ;;  %v3561_v54 = vld [vmem:[#allocation17_spill] sm:$0xff] }
 0x214   :  { %v494_v49 = vadd.f32 %v493_v51, %v492_v52  ;;  %v3563_v52 = vld [vmem:[#allocation19_spill] sm:$0xff]  ;;  %v3564_v51 = vld [vmem:[#allocation20_spill] sm:$0xff] }
 0x216   :  { %1874 = vtanh.f32 %v494_v49  ;;  %v2660_v47 = vsel %vm504_vm9, %v494_v49, %v2569_v1  ;;  %v3554_v1 = vld [vmem:[#allocation10_spill] sm:$0xff] }
 0x217   :  { %v3566_v49 = vld [vmem:[#allocation22_spill] sm:$0xff] }
 0x223   :  { %v1875_v50 = vpop.eup %1874 }
 0x224   :  { %v496_v48 = vmul.f32 %v1875_v50, %v1873_v58  ;;  %v3567_v58 = vld [vmem:[#allocation24_spill] sm:$0xff]  ;;  %v3568_v50 = vld [vmem:[#allocation25_spill] sm:$0xff] }
 0x226   :  { %v505_v56 = vsel %vm504_vm9, %v496_v48, 0.0  ;;  %v2663_v57 = vsel %vm504_vm9, %v496_v48, %v2572_v55  ;;  %v3555_v55 = vld [vmem:[#allocation11_spill] sm:$0xff]  ;;  %v3569_v48 = vld [vmem:[#allocation26_spill] sm:$0xff] }
 0x227   :  { %1807 = vst [vmem:[%s3411_s3 + $0x2] sm:$0x3] %v505_v56  ;;  %577 = vmatmul.mubr.f32.vlgmr.msra.gmra.mxu0 %v2663_v57  ;;  %648 = vmatmul.mubr.f32.vlgmr.msra.gmra.mxu1 %v2663_v57  ;;  %v3570_v56 = vmov 0.0  }
 0x228   :  { %724 = vmatpush1.msra.mxu0 %v2100_v2  ;;  %795 = vmatpush1.msra.mxu1 %v2107_v3  ;;  %v3553_v2 = vld [vmem:[#allocation9_spill] sm:$0xff] }
 0x229   :  { %725 = vmatprep.subr.mxu0 %v2112_v4  ;;  %796 = vmatprep.subr.mxu1 %v2117_v5 }
 0x22a   :  { %726 = vmatpush1.msra.mxu0 %v2126_v7  ;;  %797 = vmatpush1.msra.mxu1 %v2131_v8 }
 0x22b   :  { %727 = vmatprep.subr.mxu0 %v2136_v9  ;;  %798 = vmatprep.subr.mxu1 %v2143_v10 }
 0x22c   :  { %728 = vmatpush1.msra.mxu0 %v2148_v11  ;;  %799 = vmatpush1.msra.mxu1 %v2153_v12 }
 0x22d   :  { %729 = vmatprep.subr.mxu0 %v2160_v13  ;;  %800 = vmatprep.subr.mxu1 %v2165_v14 }
 0x22e   :  { %730 = vmatpush1.msra.mxu0 %v2172_v15  ;;  %801 = vmatpush1.msra.mxu1 %v2177_v16 }
 0x22f   :  { %731 = vmatprep.subr.mxu0 %v2184_v17  ;;  %802 = vmatprep.subr.mxu1 %v2189_v18 }
 0x230   :  { %732 = vmatpush1.msra.mxu0 %v2196_v19  ;;  %803 = vmatpush1.msra.mxu1 %v2201_v20 }
 0x231   :  { %733 = vmatprep.subr.mxu0 %v2208_v21  ;;  %804 = vmatprep.subr.mxu1 %v2213_v22 }
 0x232   :  { %734 = vmatpush1.msra.mxu0 %v2220_v23  ;;  %805 = vmatpush1.msra.mxu1 %v2225_v24 }
 0x233   :  { %735 = vmatprep.subr.mxu0 %v2232_v25  ;;  %806 = vmatprep.subr.mxu1 %v2237_v26 }
 0x234   :  { %736 = vmatpush1.msra.mxu0 %v2244_v27  ;;  %807 = vmatpush1.msra.mxu1 %v2249_v28 }
 0x235   :  { %737 = vmatprep.subr.mxu0 %v2256_v29  ;;  %808 = vmatprep.subr.mxu1 %v2261_v30 }
 0x236   :  { %738 = vmatpush1.msra.mxu0 %v2268_v31  ;;  %809 = vmatpush1.msra.mxu1 %v2273_v32 }
 0x237   :  { %739 = vmatprep.subr.mxu0 %v2280_v33  ;;  %810 = vmatprep.subr.mxu1 %v2285_v34 }
 0x238   :  { %740 = vmatpush1.msra.mxu0 %v2292_v35  ;;  %811 = vmatpush1.msra.mxu1 %v2297_v36 }
 0x239   :  { %741 = vmatprep.subr.mxu0 %v2304_v37  ;;  %812 = vmatprep.subr.mxu1 %v2309_v38 }
 0x23a   :  { %742 = vmatpush1.msra.mxu0 %v2316_v39  ;;  %813 = vmatpush1.msra.mxu1 %v2321_v40 }
 0x23b   :  { %743 = vmatprep.subr.mxu0 %v2328_v41  ;;  %814 = vmatprep.subr.mxu1 %v2333_v42 }
 0x23c   :  { %744 = vmatpush1.msra.mxu0 %v2340_v43  ;;  %815 = vmatpush1.msra.mxu1 %v2345_v44 }
 0x23d   :  { %745 = vmatprep.subr.mxu0 %v2352_v45  ;;  %816 = vmatprep.subr.mxu1 %v2357_v46 }
 0x23e   :  { %746 = vmatpush1.msra.mxu0 %v3553_v2  ;;  %817 = vmatpush1.msra.mxu1 %v3554_v1 }
 0x23f   :  { %747 = vmatprep.subr.mxu0 %v3555_v55  ;;  %818 = vmatprep.subr.mxu1 %v3556_v62 }
 0x240   :  { %748 = vmatpush1.msra.mxu0 %v3557_v0  ;;  %819 = vmatpush1.msra.mxu1 %v3558_v61 }
 0x241   :  { %749 = vmatprep.subr.mxu0 %v3559_v53  ;;  %820 = vmatprep.subr.mxu1 %v3560_v63  ;;  %v3571_v63 = vld [vmem:[#allocation27_spill] sm:$0xff] }
 0x242   :  { %750 = vmatpush1.msra.mxu0 %v3561_v54  ;;  %821 = vmatpush1.msra.mxu1 %v3562_v59  ;;  %v3572_v59 = vld [vmem:[#allocation7_spill] sm:$0xff] }
 0x243   :  { %751 = vmatprep.subr.mxu0 %v3563_v52  ;;  %822 = vmatprep.subr.mxu1 %v3564_v51  ;;  %v3573_v52 = vld [vmem:[#allocation8_spill] sm:$0xff] }
 0x244   :  { %752 = vmatpush1.msra.mxu0 %v3565_v60  ;;  %823 = vmatpush1.msra.mxu1 %v3566_v49 }
 0x245   :  { %753 = vmatprep.subr.mxu0 %v3567_v58  ;;  %824 = vmatprep.subr.mxu1 %v3568_v50 }
 0x246   :  { %754 = vmatpush1.msra.mxu0 %v3569_v48  ;;  %787 = vmatprep.mubr.f32.mxu0 %v3570_v56 }
 0x247   :  { %825 = vmatpush1.msra.mxu1 %v3571_v63  ;;  %858 = vmatprep.mubr.f32.mxu1 %v3570_v56  ;;  %v1808_v63 = vld [vmem:[%s3409_s1 + $0x10] sm:$0xff] }
 0x248   :  { %934 = vmatprep.subr.mxu0 %v3572_v59  ;;  %1005 = vmatprep.subr.mxu1 %v3573_v52 }
 0x2e7   :  { %v578_v51 = vpop.f32.mrf.mxu0  ;;  %v649_v60 = vpop.f32.mrf.mxu1 }
 0x2e9   :  { %v580_v54 = vpop.f32.mrf.mxu0  ;;  %v651_v49 = vpop.f32.mrf.mxu1 }
 0x2ea   :  { %v658_v53 = vcombine.low %v578_v51, %v580_v54  ;;  %v659_v58 = vcombine.low %v649_v60, %v651_v49 }
 0x2ec   :  { %v666_v50 = vrot.slane %v658_v53, %v2562_v6  ;;  %v673_v48 = vrot.slane %v659_v58, %v2562_v6 }
 0x2ee   :  { %v674_v61 = vcombine.low %v666_v50, %v673_v48 }
 0x2f0   :  { %v676_v56 = vadd.f32 %v1808_v63, %v674_v61  ;;  %v714_v61 = vpop.permute.xlu1 %713 }
 0x2f1   :  { %vm715_vm10 = vcmp.eq.s32.totalorder %v714_v61, 1 }
 0x2f2   :  { %v1809_v0 = vmul.f32 -1.442695, %v676_v56  ;;  %v684_v59 = vrot.slane %v676_v56, 2  ;;  %v695_v62 = vrot.slane %v676_v56, 6  ;;  %v692_v54 = vrot.slane %v676_v56, 4 }
 0x2f4   :  { %1876 = vpow2.f32 %v1809_v0  ;;  %v1810_v52 = vmul.f32 -1.442695, %v684_v59  ;;  %v1811_v55 = vmul.f32 -1.442695, %v695_v62 }
 0x2f6   :  { %1878 = vpow2.f32 %v1810_v52 }
 0x2f7   :  { %1880 = vpow2.f32 %v1811_v55 }
 0x301   :  { %v1877_v1 = vpop.eup %1876 }
 0x302   :  { %v680_v51 = vadd.f32 1.0, %v1877_v1 }
 0x303   :  { %v1879_v60 = vpop.eup %1878 }
 0x304   :  { %1882 = vrcp.f32 %v680_v51  ;;  %v689_v53 = vadd.f32 1.0, %v1879_v60  ;;  %v1881_v49 = vpop.eup %1880 }
 0x305   :  { %1884 = vtanh.f32 %v692_v54  ;;  %v700_v48 = vadd.f32 1.0, %v1881_v49 }
 0x306   :  { %1886 = vrcp.f32 %v689_v53 }
 0x307   :  { %1888 = vrcp.f32 %v700_v48 }
 0x311   :  { %v1883_v58 = vpop.eup %1882 }
 0x312   :  { %v1885_v50 = vpop.eup %1884 }
 0x313   :  { %v1887_v63 = vpop.eup %1886  ;;  %v704_v59 = vmul.f32 %v1885_v50, %v1883_v58  ;;  %v925_v58 = vpop.permute.xlu1 %924 }
 0x314   :  { %v703_v0 = vmul.f32 %v1887_v63, %v2660_v47  ;;  %v1889_v55 = vpop.eup %1888  ;;  %vm926_vm11 = vcmp.eq.s32.totalorder %v925_v58, 1  ;;  %v3161_v58 = vld [vmem:[%s3410_s2 + $0x40] sm:$0xff] }
 0x316   :  { %v705_v62 = vadd.f32 %v704_v59, %v703_v0 }
 0x318   :  { %1890 = vtanh.f32 %v705_v62  ;;  %v2743_v1 = vsel %vm715_vm10, %v705_v62, %v2660_v47  ;;  %v2756_v47 = vld [vmem:[%s3410_s2 + $0x1e0] sm:$0xff] }
 0x325   :  { %v1891_v56 = vpop.eup %1890 }
 0x326   :  { %v707_v52 = vmul.f32 %v1891_v56, %v1889_v55  ;;  %v2861_v55 = vld [vmem:[%s3410_s2 + $0x1c8] sm:$0xff]  ;;  %v2867_v56 = vld [vmem:[%s3410_s2 + $0x1d8] sm:$0xff] }
 0x328   :  { %v716_v54 = vsel %vm715_vm10, %v707_v52, 0.0  ;;  %v2746_v51 = vsel %vm715_vm10, %v707_v52, %v2663_v57  ;;  %v2873_v52 = vld [vmem:[%s3410_s2 + $0x1c0] sm:$0xff] }
 0x329   :  { %1812 = vst [vmem:[%s3411_s3 + $0x4] sm:$0x3] %v716_v54  ;;  %788 = vmatmul.mubr.f32.vlgmr.msra.gmra.mxu0 %v2746_v51  ;;  %859 = vmatmul.mubr.f32.vlgmr.msra.gmra.mxu1 %v2746_v51  ;;  %v2879_v54 = vld [vmem:[%s3410_s2 + $0x1d0] sm:$0xff] }
 0x32a   :  { %935 = vmatpush1.msra.mxu0 %v2756_v47  ;;  %1006 = vmatpush1.msra.mxu1 %v2107_v3  ;;  %v3574_v3 = vld [vmem:[#allocation10_spill] sm:$0xff] }
 0x32b   :  { %936 = vmatprep.subr.mxu0 %v2112_v4  ;;  %1007 = vmatprep.subr.mxu1 %v2117_v5  ;;  %v3575_v4 = vld [vmem:[#allocation11_spill] sm:$0xff]  ;;  %v3576_v5 = vld [vmem:[#allocation12_spill] sm:$0xff] }
 0x32c   :  { %937 = vmatpush1.msra.mxu0 %v2126_v7  ;;  %1008 = vmatpush1.msra.mxu1 %v2131_v8  ;;  %v3577_v7 = vld [vmem:[#allocation13_spill] sm:$0xff]  ;;  %v3578_v8 = vld [vmem:[#allocation14_spill] sm:$0xff] }
 0x32d   :  { %938 = vmatprep.subr.mxu0 %v2136_v9  ;;  %1009 = vmatprep.subr.mxu1 %v2143_v10  ;;  %v3579_v9 = vld [vmem:[#allocation15_spill] sm:$0xff]  ;;  %v3580_v10 = vld [vmem:[#allocation16_spill] sm:$0xff] }
 0x32e   :  { %939 = vmatpush1.msra.mxu0 %v2148_v11  ;;  %1010 = vmatpush1.msra.mxu1 %v2153_v12  ;;  %v3581_v11 = vld [vmem:[#allocation17_spill] sm:$0xff]  ;;  %v3582_v12 = vld [vmem:[#allocation18_spill] sm:$0xff]  ;;  %3602 = vst [vmem:[#allocation16_spill] sm:$0xff] %v3161_v58 }
 0x32f   :  { %940 = vmatprep.subr.mxu0 %v2160_v13  ;;  %1011 = vmatprep.subr.mxu1 %v2165_v14  ;;  %v3583_v13 = vld [vmem:[#allocation19_spill] sm:$0xff]  ;;  %v3584_v14 = vld [vmem:[#allocation20_spill] sm:$0xff] }
 0x330   :  { %941 = vmatpush1.msra.mxu0 %v2172_v15  ;;  %1012 = vmatpush1.msra.mxu1 %v2177_v16  ;;  %v3585_v15 = vld [vmem:[#allocation21_spill] sm:$0xff]  ;;  %v3586_v16 = vld [vmem:[#allocation22_spill] sm:$0xff] }
 0x331   :  { %942 = vmatprep.subr.mxu0 %v2184_v17  ;;  %1013 = vmatprep.subr.mxu1 %v2189_v18  ;;  %v3587_v17 = vld [vmem:[#allocation24_spill] sm:$0xff]  ;;  %v3588_v18 = vld [vmem:[#allocation25_spill] sm:$0xff] }
 0x332   :  { %943 = vmatpush1.msra.mxu0 %v2196_v19  ;;  %1014 = vmatpush1.msra.mxu1 %v2201_v20  ;;  %v3589_v19 = vld [vmem:[#allocation26_spill] sm:$0xff]  ;;  %v3590_v20 = vmov 0.0  }
 0x333   :  { %944 = vmatprep.subr.mxu0 %v2208_v21  ;;  %1015 = vmatprep.subr.mxu1 %v2213_v22  ;;  %v3591_v21 = vld [vmem:[#allocation27_spill] sm:$0xff] }
 0x334   :  { %945 = vmatpush1.msra.mxu0 %v2220_v23  ;;  %1016 = vmatpush1.msra.mxu1 %v2225_v24  ;;  %v2825_v22 = vld [vmem:[%s3410_s2 + $0x1e8] sm:$0xff]  ;;  %v2831_v23 = vld [vmem:[%s3410_s2 + $0x1f8] sm:$0xff] }
 0x335   :  { %946 = vmatprep.subr.mxu0 %v2232_v25  ;;  %1017 = vmatprep.subr.mxu1 %v2237_v26  ;;  %3592 = vst [vmem:[#allocation23_spill] sm:$0xff] %v2825_v22  ;;  %3593 = vst [vmem:[#allocation9_spill] sm:$0xff] %v2831_v23 }
 0x336   :  { %947 = vmatpush1.msra.mxu0 %v2244_v27  ;;  %1018 = vmatpush1.msra.mxu1 %v2249_v28 }
 0x337   :  { %948 = vmatprep.subr.mxu0 %v2256_v29  ;;  %1019 = vmatprep.subr.mxu1 %v2261_v30 }
 0x338   :  { %949 = vmatpush1.msra.mxu0 %v2268_v31  ;;  %1020 = vmatpush1.msra.mxu1 %v2273_v32  ;;  %v1813_v32 = vld [vmem:[%s3409_s1 + $0x18] sm:$0xff] }
 0x339   :  { %950 = vmatprep.subr.mxu0 %v2280_v33  ;;  %1021 = vmatprep.subr.mxu1 %v2285_v34 }
 0x33a   :  { %951 = vmatpush1.msra.mxu0 %v2292_v35  ;;  %1022 = vmatpush1.msra.mxu1 %v2297_v36 }
 0x33b   :  { %952 = vmatprep.subr.mxu0 %v2304_v37  ;;  %1023 = vmatprep.subr.mxu1 %v2309_v38 }
 0x33c   :  { %953 = vmatpush1.msra.mxu0 %v2316_v39  ;;  %1024 = vmatpush1.msra.mxu1 %v2321_v40 }
 0x33d   :  { %954 = vmatprep.subr.mxu0 %v2328_v41  ;;  %1025 = vmatprep.subr.mxu1 %v2333_v42 }
 0x33e   :  { %955 = vmatpush1.msra.mxu0 %v2340_v43  ;;  %1026 = vmatpush1.msra.mxu1 %v2345_v44 }
 0x33f   :  { %956 = vmatprep.subr.mxu0 %v2352_v45  ;;  %1027 = vmatprep.subr.mxu1 %v2357_v46 }
 0x340   :  { %957 = vmatpush1.msra.mxu0 %v3553_v2  ;;  %1028 = vmatpush1.msra.mxu1 %v3574_v3  ;;  %v2891_v3 = vld [vmem:[%s3410_s2 + $0x1b8] sm:$0xff] }
 0x341   :  { %958 = vmatprep.subr.mxu0 %v3575_v4  ;;  %1029 = vmatprep.subr.mxu1 %v3576_v5  ;;  %v2897_v4 = vld [vmem:[%s3410_s2 + $0x1a0] sm:$0xff]  ;;  %v2903_v5 = vld [vmem:[%s3410_s2 + $0x1b0] sm:$0xff] }
 0x342   :  { %959 = vmatpush1.msra.mxu0 %v3577_v7  ;;  %1030 = vmatpush1.msra.mxu1 %v3578_v8  ;;  %v2909_v7 = vld [vmem:[%s3410_s2 + $0x188] sm:$0xff]  ;;  %v2915_v8 = vld [vmem:[%s3410_s2 + $0x198] sm:$0xff] }
 0x343   :  { %960 = vmatprep.subr.mxu0 %v3579_v9  ;;  %1031 = vmatprep.subr.mxu1 %v3580_v10  ;;  %v2921_v9 = vld [vmem:[%s3410_s2 + $0x180] sm:$0xff]  ;;  %v2927_v10 = vld [vmem:[%s3410_s2 + $0x190] sm:$0xff] }
 0x344   :  { %961 = vmatpush1.msra.mxu0 %v3581_v11  ;;  %1032 = vmatpush1.msra.mxu1 %v3582_v12  ;;  %v2933_v11 = vld [vmem:[%s3410_s2 + $0x168] sm:$0xff]  ;;  %v2939_v12 = vld [vmem:[%s3410_s2 + $0x178] sm:$0xff] }
 0x345   :  { %962 = vmatprep.subr.mxu0 %v3583_v13  ;;  %1033 = vmatprep.subr.mxu1 %v3584_v14  ;;  %v2945_v13 = vld [vmem:[%s3410_s2 + $0x160] sm:$0xff]  ;;  %v2951_v14 = vld [vmem:[%s3410_s2 + $0x170] sm:$0xff] }
 0x346   :  { %963 = vmatpush1.msra.mxu0 %v3585_v15  ;;  %1034 = vmatpush1.msra.mxu1 %v3586_v16  ;;  %v2957_v15 = vld [vmem:[%s3410_s2 + $0x148] sm:$0xff]  ;;  %v2963_v16 = vld [vmem:[%s3410_s2 + $0x158] sm:$0xff] }
 0x347   :  { %964 = vmatprep.subr.mxu0 %v3587_v17  ;;  %1035 = vmatprep.subr.mxu1 %v3588_v18  ;;  %v2969_v17 = vld [vmem:[%s3410_s2 + $0x140] sm:$0xff]  ;;  %v2975_v18 = vld [vmem:[%s3410_s2 + $0x150] sm:$0xff] }
 0x348   :  { %965 = vmatpush1.msra.mxu0 %v3589_v19  ;;  %998 = vmatprep.mubr.f32.mxu0 %v3590_v20  ;;  %v2981_v19 = vld [vmem:[%s3410_s2 + $0x128] sm:$0xff] }
 0x349   :  { %1036 = vmatpush1.msra.mxu1 %v3591_v21  ;;  %1069 = vmatprep.mubr.f32.mxu1 %v3590_v20  ;;  %v2987_v21 = vld [vmem:[%s3410_s2 + $0x138] sm:$0xff] }
 0x34a   :  { %1145 = vmatprep.subr.mxu0 %v2825_v22  ;;  %1216 = vmatprep.subr.mxu1 %v2831_v23 }
 0x3e9   :  { %v789_v24 = vpop.f32.mrf.mxu0  ;;  %v860_v25 = vpop.f32.mrf.mxu1 }
 0x3eb   :  { %v791_v26 = vpop.f32.mrf.mxu0  ;;  %v862_v27 = vpop.f32.mrf.mxu1 }
 0x3ec   :  { %v869_v28 = vcombine.low %v789_v24, %v791_v26  ;;  %v870_v29 = vcombine.low %v860_v25, %v862_v27  ;;  %v2993_v24 = vld [vmem:[%s3410_s2 + $0x120] sm:$0xff]  ;;  %v2999_v25 = vld [vmem:[%s3410_s2 + $0x130] sm:$0xff]  ;;  %v3005_v26 = vld [vmem:[%s3410_s2 + $0x108] sm:$0xff] }
 0x3ed   :  { %v3011_v27 = vld [vmem:[%s3410_s2 + $0x118] sm:$0xff] }
 0x3ee   :  { %v877_v30 = vrot.slane %v869_v28, %v2562_v6  ;;  %v884_v31 = vrot.slane %v870_v29, %v2562_v6  ;;  %v3017_v28 = vld [vmem:[%s3410_s2 + $0x100] sm:$0xff]  ;;  %v3023_v29 = vld [vmem:[%s3410_s2 + $0x110] sm:$0xff] }
 0x3f0   :  { %v885_v33 = vcombine.low %v877_v30, %v884_v31  ;;  %v3029_v30 = vld [vmem:[%s3410_s2 + $0xe8] sm:$0xff]  ;;  %v3035_v31 = vld [vmem:[%s3410_s2 + $0xf8] sm:$0xff] }
 0x3f2   :  { %v887_v34 = vadd.f32 %v1813_v32, %v885_v33  ;;  %v3041_v32 = vld [vmem:[%s3410_s2 + $0xe0] sm:$0xff]  ;;  %v3047_v33 = vld [vmem:[%s3410_s2 + $0xf0] sm:$0xff] }
 0x3f4   :  { %v1814_v35 = vmul.f32 -1.442695, %v887_v34  ;;  %v895_v36 = vrot.slane %v887_v34, 2  ;;  %v906_v38 = vrot.slane %v887_v34, 6  ;;  %v903_v41 = vrot.slane %v887_v34, 4  ;;  %v3053_v34 = vld [vmem:[%s3410_s2 + $0xc8] sm:$0xff] }
 0x3f6   :  { %1892 = vpow2.f32 %v1814_v35  ;;  %v1815_v37 = vmul.f32 -1.442695, %v895_v36  ;;  %v1816_v39 = vmul.f32 -1.442695, %v906_v38  ;;  %v3059_v35 = vld [vmem:[%s3410_s2 + $0xd8] sm:$0xff]  ;;  %v3065_v36 = vld [vmem:[%s3410_s2 + $0xc0] sm:$0xff] }
 0x3f7   :  { %v3077_v38 = vld [vmem:[%s3410_s2 + $0xa8] sm:$0xff] }
 0x3f8   :  { %1894 = vpow2.f32 %v1815_v37  ;;  %v3071_v37 = vld [vmem:[%s3410_s2 + $0xd0] sm:$0xff] }
 0x3f9   :  { %1896 = vpow2.f32 %v1816_v39  ;;  %v3083_v39 = vld [vmem:[%s3410_s2 + $0xb8] sm:$0xff] }
 0x403   :  { %v1893_v40 = vpop.eup %1892 }
 0x404   :  { %v891_v42 = vadd.f32 1.0, %v1893_v40  ;;  %v3089_v40 = vld [vmem:[%s3410_s2 + $0xa0] sm:$0xff] }
 0x405   :  { %v1895_v43 = vpop.eup %1894 }
 0x406   :  { %1898 = vrcp.f32 %v891_v42  ;;  %v900_v44 = vadd.f32 1.0, %v1895_v43  ;;  %v1897_v45 = vpop.eup %1896  ;;  %v3101_v42 = vld [vmem:[%s3410_s2 + $0x88] sm:$0xff]  ;;  %v3107_v43 = vld [vmem:[%s3410_s2 + $0x98] sm:$0xff] }
 0x407   :  { %1900 = vtanh.f32 %v903_v41  ;;  %v911_v60 = vadd.f32 1.0, %v1897_v45  ;;  %v3095_v41 = vld [vmem:[%s3410_s2 + $0xb0] sm:$0xff] }
 0x408   :  { %1902 = vrcp.f32 %v900_v44  ;;  %v3113_v44 = vld [vmem:[%s3410_s2 + $0x80] sm:$0xff]  ;;  %v3119_v45 = vld [vmem:[%s3410_s2 + $0x90] sm:$0xff] }
 0x409   :  { %1904 = vrcp.f32 %v911_v60  ;;  %3594 = vst [vmem:[#allocation7_spill] sm:$0xff] %v3113_v44  ;;  %3595 = vst [vmem:[#allocation8_spill] sm:$0xff] %v3119_v45  ;;  %v3143_v60 = vld [vmem:[%s3410_s2 + $0x70] sm:$0xff] }
 0x40a   :  { %3599 = vst [vmem:[#allocation13_spill] sm:$0xff] %v3143_v60 }
 0x413   :  { %v1899_v46 = vpop.eup %1898 }
 0x414   :  { %v1901_v57 = vpop.eup %1900 }
 0x415   :  { %v1903_v2 = vpop.eup %1902  ;;  %v915_v49 = vmul.f32 %v1901_v57, %v1899_v46  ;;  %v3125_v46 = vld [vmem:[%s3410_s2 + $0x68] sm:$0xff]  ;;  %v3131_v57 = vld [vmem:[%s3410_s2 + $0x78] sm:$0xff] }
 0x416   :  { %v914_v53 = vmul.f32 %v1903_v2, %v2743_v1  ;;  %v1905_v63 = vpop.eup %1904  ;;  %3596 = vst [vmem:[#allocation10_spill] sm:$0xff] %v3125_v46  ;;  %3597 = vst [vmem:[#allocation11_spill] sm:$0xff] %v3131_v57  ;;  %v3137_v2 = vld [vmem:[%s3410_s2 + $0x60] sm:$0xff] }
 0x417   :  { %3598 = vst [vmem:[#allocation12_spill] sm:$0xff] %v3137_v2 }
 0x418   :  { %v916_v50 = vadd.f32 %v915_v49, %v914_v53  ;;  %v3149_v53 = vld [vmem:[%s3410_s2 + $0x48] sm:$0xff]  ;;  %v3155_v49 = vld [vmem:[%s3410_s2 + $0x58] sm:$0xff] }
 0x419   :  { %3600 = vst [vmem:[#allocation14_spill] sm:$0xff] %v3149_v53  ;;  %3601 = vst [vmem:[#allocation15_spill] sm:$0xff] %v3155_v49 }
 0x41a   :  { %1906 = vtanh.f32 %v916_v50  ;;  %v2841_v61 = vsel %vm926_vm11, %v916_v50, %v2743_v1  ;;  %v2855_v1 = vld [vmem:[%s3410_s2 + $0x1f0] sm:$0xff] }
 0x41b   :  { %v3167_v50 = vld [vmem:[%s3410_s2 + $0x50] sm:$0xff] }
 0x41c   :  { %3603 = vst [vmem:[#allocation17_spill] sm:$0xff] %v3167_v50 }
 0x427   :  { %v1907_v48 = vpop.eup %1906 }
 0x428   :  { %v918_v0 = vmul.f32 %v1907_v48, %v1905_v63  ;;  %v3173_v63 = vld [vmem:[%s3410_s2 + $0x28] sm:$0xff]  ;;  %v3179_v48 = vld [vmem:[%s3410_s2 + $0x38] sm:$0xff] }
 0x429   :  { %3604 = vst [vmem:[#allocation18_spill] sm:$0xff] %v3173_v63  ;;  %3605 = vst [vmem:[#allocation19_spill] sm:$0xff] %v3179_v48 }
 0x42a   :  { %v927_v59 = vsel %vm926_vm11, %v918_v0, 0.0  ;;  %v2844_v62 = vsel %vm926_vm11, %v918_v0, %v2746_v51  ;;  %v2885_v51 = vld [vmem:[%s3410_s2 + $0x1a8] sm:$0xff]  ;;  %v3185_v0 = vld [vmem:[%s3410_s2 + $0x20] sm:$0xff] }
 0x42b   :  { %1817 = vst [vmem:[%s3411_s3 + $0x6] sm:$0x3] %v927_v59  ;;  %999 = vmatmul.mubr.f32.vlgmr.msra.gmra.mxu0 %v2844_v62  ;;  %1070 = vmatmul.mubr.f32.vlgmr.msra.gmra.mxu1 %v2844_v62  ;;  %3606 = vst [vmem:[#allocation20_spill] sm:$0xff] %v3185_v0  ;;  %v3191_v59 = vld [vmem:[%s3410_s2 + $0x30] sm:$0xff] }
 0x42c   :  { %1146 = vmatpush1.msra.mxu0 %v2756_v47  ;;  %1217 = vmatpush1.msra.mxu1 %v2855_v1  ;;  %3607 = vst [vmem:[#allocation21_spill] sm:$0xff] %v3191_v59 }
 0x42d   :  { %1147 = vmatprep.subr.mxu0 %v2861_v55  ;;  %1218 = vmatprep.subr.mxu1 %v2867_v56 }
 0x42e   :  { %1148 = vmatpush1.msra.mxu0 %v2873_v52  ;;  %1219 = vmatpush1.msra.mxu1 %v2879_v54 }
 0x42f   :  { %1149 = vmatprep.subr.mxu0 %v2885_v51  ;;  %1220 = vmatprep.subr.mxu1 %v2891_v3 }
 0x430   :  { %1150 = vmatpush1.msra.mxu0 %v2897_v4  ;;  %1221 = vmatpush1.msra.mxu1 %v2903_v5 }
 0x431   :  { %1151 = vmatprep.subr.mxu0 %v2909_v7  ;;  %1222 = vmatprep.subr.mxu1 %v2915_v8 }
 0x432   :  { %1152 = vmatpush1.msra.mxu0 %v2921_v9  ;;  %1223 = vmatpush1.msra.mxu1 %v2927_v10 }
 0x433   :  { %1153 = vmatprep.subr.mxu0 %v2933_v11  ;;  %1224 = vmatprep.subr.mxu1 %v2939_v12 }
 0x434   :  { %1154 = vmatpush1.msra.mxu0 %v2945_v13  ;;  %1225 = vmatpush1.msra.mxu1 %v2951_v14 }
 0x435   :  { %1155 = vmatprep.subr.mxu0 %v2957_v15  ;;  %1226 = vmatprep.subr.mxu1 %v2963_v16 }
 0x436   :  { %1156 = vmatpush1.msra.mxu0 %v2969_v17  ;;  %1227 = vmatpush1.msra.mxu1 %v2975_v18 }
 0x437   :  { %1157 = vmatprep.subr.mxu0 %v2981_v19  ;;  %1228 = vmatprep.subr.mxu1 %v2987_v21 }
 0x438   :  { %1158 = vmatpush1.msra.mxu0 %v2993_v24  ;;  %1229 = vmatpush1.msra.mxu1 %v2999_v25 }
 0x439   :  { %1159 = vmatprep.subr.mxu0 %v3005_v26  ;;  %1230 = vmatprep.subr.mxu1 %v3011_v27 }
 0x43a   :  { %1160 = vmatpush1.msra.mxu0 %v3017_v28  ;;  %1231 = vmatpush1.msra.mxu1 %v3023_v29 }
 0x43b   :  { %1161 = vmatprep.subr.mxu0 %v3029_v30  ;;  %1232 = vmatprep.subr.mxu1 %v3035_v31 }
 0x43c   :  { %1162 = vmatpush1.msra.mxu0 %v3041_v32  ;;  %1233 = vmatpush1.msra.mxu1 %v3047_v33 }
 0x43d   :  { %1163 = vmatprep.subr.mxu0 %v3053_v34  ;;  %1234 = vmatprep.subr.mxu1 %v3059_v35 }
 0x43e   :  { %1164 = vmatpush1.msra.mxu0 %v3065_v36  ;;  %1235 = vmatpush1.msra.mxu1 %v3071_v37 }
 0x43f   :  { %1165 = vmatprep.subr.mxu0 %v3077_v38  ;;  %1236 = vmatprep.subr.mxu1 %v3083_v39 }
 0x440   :  { %1166 = vmatpush1.msra.mxu0 %v3089_v40  ;;  %1237 = vmatpush1.msra.mxu1 %v3095_v41 }
 0x441   :  { %1167 = vmatprep.subr.mxu0 %v3101_v42  ;;  %1238 = vmatprep.subr.mxu1 %v3107_v43 }
 0x442   :  { %1168 = vmatpush1.msra.mxu0 %v3113_v44  ;;  %1239 = vmatpush1.msra.mxu1 %v3119_v45 }
 0x443   :  { %1169 = vmatprep.subr.mxu0 %v3125_v46  ;;  %1240 = vmatprep.subr.mxu1 %v3131_v57 }
 0x444   :  { %1170 = vmatpush1.msra.mxu0 %v3137_v2  ;;  %1241 = vmatpush1.msra.mxu1 %v3143_v60 }
 0x445   :  { %1171 = vmatprep.subr.mxu0 %v3149_v53  ;;  %1242 = vmatprep.subr.mxu1 %v3155_v49 }
 0x446   :  { %1172 = vmatpush1.msra.mxu0 %v3161_v58  ;;  %1243 = vmatpush1.msra.mxu1 %v3167_v50 }
 0x447   :  { %1173 = vmatprep.subr.mxu0 %v3173_v63  ;;  %1244 = vmatprep.subr.mxu1 %v3179_v48  ;;  %v3197_v63 = vld [vmem:[%s3410_s2 + $0x8] sm:$0xff]  ;;  %v3203_v48 = vld [vmem:[%s3410_s2 + $0x18] sm:$0xff] }
 0x448   :  { %1174 = vmatpush1.msra.mxu0 %v3185_v0  ;;  %1245 = vmatpush1.msra.mxu1 %v3191_v59  ;;  %3608 = vst [vmem:[#allocation22_spill] sm:$0xff] %v3197_v63  ;;  %3609 = vst [vmem:[#allocation24_spill] sm:$0xff] %v3203_v48  ;;  %v3209_v0 = vld [vmem:[%s3410_s2] sm:$0xff] }
 0x449   :  { %1175 = vmatprep.subr.mxu0 %v3197_v63  ;;  %1246 = vmatprep.subr.mxu1 %v3203_v48  ;;  %3610 = vst [vmem:[#allocation25_spill] sm:$0xff] %v3209_v0  ;;  %v3216_v63 = vld [vmem:[%s3410_s2 + $0x10] sm:$0xff] }
 0x44a   :  { %1176 = vmatpush1.msra.mxu0 %v3209_v0  ;;  %1209 = vmatprep.mubr.f32.mxu0 %v3590_v20  ;;  %3611 = vst [vmem:[#allocation26_spill] sm:$0xff] %v3216_v63 }
 0x44b   :  { %1247 = vmatpush1.msra.mxu1 %v3216_v63  ;;  %1280 = vmatprep.mubr.f32.mxu1 %v3590_v20  ;;  %v1818_v63 = vld [vmem:[%s3409_s1 + $0x20] sm:$0xff] }
 0x44c   :  { %1356 = vmatprep.subr.mxu0 %v2825_v22  ;;  %1427 = vmatprep.subr.mxu1 %v2831_v23 }
 0x4eb   :  { %v1000_v48 = vpop.f32.mrf.mxu0  ;;  %v1071_v59 = vpop.f32.mrf.mxu1 }
 0x4ed   :  { %v1002_v50 = vpop.f32.mrf.mxu0  ;;  %v1073_v58 = vpop.f32.mrf.mxu1 }
 0x4ee   :  { %v1080_v0 = vcombine.low %v1000_v48, %v1002_v50  ;;  %v1081_v49 = vcombine.low %v1071_v59, %v1073_v58 }
 0x4f0   :  { %v1088_v53 = vrot.slane %v1080_v0, %v2562_v6  ;;  %v1095_v60 = vrot.slane %v1081_v49, %v2562_v6 }
 0x4f2   :  { %v1096_v2 = vcombine.low %v1088_v53, %v1095_v60 }
 0x4f4   :  { %v1098_v20 = vadd.f32 %v1818_v63, %v1096_v2 }
 0x4f6   :  { %v1819_v57 = vmul.f32 -1.442695, %v1098_v20  ;;  %v1106_v22 = vrot.slane %v1098_v20, 2  ;;  %v1117_v46 = vrot.slane %v1098_v20, 6  ;;  %v1114_v50 = vrot.slane %v1098_v20, 4 }
 0x4f8   :  { %1908 = vpow2.f32 %v1819_v57  ;;  %v1820_v23 = vmul.f32 -1.442695, %v1106_v22  ;;  %v1821_v45 = vmul.f32 -1.442695, %v1117_v46 }
 0x4fa   :  { %1910 = vpow2.f32 %v1820_v23  ;;  %v1136_v23 = vpop.permute.xlu0 %1135 }
 0x4fb   :  { %1912 = vpow2.f32 %v1821_v45  ;;  %vm1137_vm12 = vcmp.eq.s32.totalorder %v1136_v23, 1  ;;  %v3623_v23 = vld [vmem:[#allocation19_spill] sm:$0xff] }
 0x505   :  { %v1909_v44 = vpop.eup %1908 }
 0x506   :  { %v1102_v58 = vadd.f32 1.0, %v1909_v44 }
 0x507   :  { %v1911_v48 = vpop.eup %1910 }
 0x508   :  { %1914 = vrcp.f32 %v1102_v58  ;;  %v1111_v49 = vadd.f32 1.0, %v1911_v48  ;;  %v1913_v0 = vpop.eup %1912  ;;  %v3614_v48 = vld [vmem:[#allocation10_spill] sm:$0xff] }
 0x509   :  { %1916 = vtanh.f32 %v1114_v50  ;;  %v1122_v53 = vadd.f32 1.0, %v1913_v0  ;;  %v3616_v0 = vld [vmem:[#allocation12_spill] sm:$0xff] }
 0x50a   :  { %1918 = vrcp.f32 %v1111_v49  ;;  %v3615_v49 = vld [vmem:[#allocation11_spill] sm:$0xff] }
 0x50b   :  { %1920 = vrcp.f32 %v1122_v53  ;;  %v3620_v53 = vld [vmem:[#allocation16_spill] sm:$0xff] }
 0x515   :  { %v1915_v59 = vpop.eup %1914 }
 0x516   :  { %v1917_v60 = vpop.eup %1916 }
 0x517   :  { %v1919_v2 = vpop.eup %1918  ;;  %v1126_v22 = vmul.f32 %v1917_v60, %v1915_v59  ;;  %v3617_v59 = vld [vmem:[#allocation13_spill] sm:$0xff]  ;;  %v3618_v60 = vld [vmem:[#allocation14_spill] sm:$0xff] }
 0x518   :  { %v1125_v57 = vmul.f32 %v1919_v2, %v2841_v61  ;;  %v1921_v44 = vpop.eup %1920  ;;  %v3619_v2 = vld [vmem:[#allocation15_spill] sm:$0xff] }
 0x51a   :  { %v1127_v63 = vadd.f32 %v1126_v22, %v1125_v57  ;;  %v3621_v57 = vld [vmem:[#allocation17_spill] sm:$0xff]  ;;  %v3622_v22 = vld [vmem:[#allocation18_spill] sm:$0xff] }
 0x51c   :  { %1922 = vtanh.f32 %v1127_v63  ;;  %v3229_v20 = vsel %vm1137_vm12, %v1127_v63, %v2841_v61  ;;  %v3612_v61 = vld [vmem:[#allocation7_spill] sm:$0xff]  ;;  %v3624_v63 = vld [vmem:[#allocation20_spill] sm:$0xff] }
 0x529   :  { %v1923_v45 = vpop.eup %1922 }
 0x52a   :  { %v1129_v46 = vmul.f32 %v1923_v45, %v1921_v44  ;;  %v3625_v44 = vld [vmem:[#allocation21_spill] sm:$0xff]  ;;  %v3626_v45 = vld [vmem:[#allocation22_spill] sm:$0xff] }
 0x52c   :  { %v1138_v50 = vsel %vm1137_vm12, %v1129_v46, 0.0  ;;  %v3232_v58 = vsel %vm1137_vm12, %v1129_v46, %v2844_v62  ;;  %v3613_v62 = vld [vmem:[#allocation8_spill] sm:$0xff] }
 0x52d   :  { %1822 = vst [vmem:[%s3411_s3 + $0x8] sm:$0x3] %v1138_v50  ;;  %1210 = vmatmul.mubr.f32.vlgmr.msra.gmra.mxu0 %v3232_v58  ;;  %1281 = vmatmul.mubr.f32.vlgmr.msra.gmra.mxu1 %v3232_v58  ;;  %v3627_v46 = vld [vmem:[#allocation24_spill] sm:$0xff]  ;;  %v3628_v50 = vld [vmem:[#allocation25_spill] sm:$0xff] }
 0x52e   :  { %1357 = vmatpush1.msra.mxu0 %v2756_v47  ;;  %1428 = vmatpush1.msra.mxu1 %v2855_v1 }
 0x52f   :  { %1358 = vmatprep.subr.mxu0 %v2861_v55  ;;  %1429 = vmatprep.subr.mxu1 %v2867_v56 }
 0x530   :  { %1359 = vmatpush1.msra.mxu0 %v2873_v52  ;;  %1430 = vmatpush1.msra.mxu1 %v2879_v54 }
 0x531   :  { %1360 = vmatprep.subr.mxu0 %v2885_v51  ;;  %1431 = vmatprep.subr.mxu1 %v2891_v3 }
 0x532   :  { %1361 = vmatpush1.msra.mxu0 %v2897_v4  ;;  %1432 = vmatpush1.msra.mxu1 %v2903_v5 }
 0x533   :  { %1362 = vmatprep.subr.mxu0 %v2909_v7  ;;  %1433 = vmatprep.subr.mxu1 %v2915_v8 }
 0x534   :  { %1363 = vmatpush1.msra.mxu0 %v2921_v9  ;;  %1434 = vmatpush1.msra.mxu1 %v2927_v10 }
 0x535   :  { %1364 = vmatprep.subr.mxu0 %v2933_v11  ;;  %1435 = vmatprep.subr.mxu1 %v2939_v12 }
 0x536   :  { %1365 = vmatpush1.msra.mxu0 %v2945_v13  ;;  %1436 = vmatpush1.msra.mxu1 %v2951_v14 }
 0x537   :  { %1366 = vmatprep.subr.mxu0 %v2957_v15  ;;  %1437 = vmatprep.subr.mxu1 %v2963_v16 }
 0x538   :  { %1367 = vmatpush1.msra.mxu0 %v2969_v17  ;;  %1438 = vmatpush1.msra.mxu1 %v2975_v18 }
 0x539   :  { %1368 = vmatprep.subr.mxu0 %v2981_v19  ;;  %1439 = vmatprep.subr.mxu1 %v2987_v21 }
 0x53a   :  { %1369 = vmatpush1.msra.mxu0 %v2993_v24  ;;  %1440 = vmatpush1.msra.mxu1 %v2999_v25 }
 0x53b   :  { %1370 = vmatprep.subr.mxu0 %v3005_v26  ;;  %1441 = vmatprep.subr.mxu1 %v3011_v27 }
 0x53c   :  { %1371 = vmatpush1.msra.mxu0 %v3017_v28  ;;  %1442 = vmatpush1.msra.mxu1 %v3023_v29 }
 0x53d   :  { %1372 = vmatprep.subr.mxu0 %v3029_v30  ;;  %1443 = vmatprep.subr.mxu1 %v3035_v31 }
 0x53e   :  { %1373 = vmatpush1.msra.mxu0 %v3041_v32  ;;  %1444 = vmatpush1.msra.mxu1 %v3047_v33 }
 0x53f   :  { %1374 = vmatprep.subr.mxu0 %v3053_v34  ;;  %1445 = vmatprep.subr.mxu1 %v3059_v35 }
 0x540   :  { %1375 = vmatpush1.msra.mxu0 %v3065_v36  ;;  %1446 = vmatpush1.msra.mxu1 %v3071_v37 }
 0x541   :  { %1376 = vmatprep.subr.mxu0 %v3077_v38  ;;  %1447 = vmatprep.subr.mxu1 %v3083_v39 }
 0x542   :  { %1377 = vmatpush1.msra.mxu0 %v3089_v40  ;;  %1448 = vmatpush1.msra.mxu1 %v3095_v41 }
 0x543   :  { %1378 = vmatprep.subr.mxu0 %v3101_v42  ;;  %1449 = vmatprep.subr.mxu1 %v3107_v43 }
 0x544   :  { %1379 = vmatpush1.msra.mxu0 %v3612_v61  ;;  %1450 = vmatpush1.msra.mxu1 %v3613_v62 }
 0x545   :  { %1380 = vmatprep.subr.mxu0 %v3614_v48  ;;  %1451 = vmatprep.subr.mxu1 %v3615_v49 }
 0x546   :  { %1381 = vmatpush1.msra.mxu0 %v3616_v0  ;;  %1452 = vmatpush1.msra.mxu1 %v3617_v59 }
 0x547   :  { %1382 = vmatprep.subr.mxu0 %v3618_v60  ;;  %1453 = vmatprep.subr.mxu1 %v3619_v2  ;;  %v3629_v60 = vmov 0.0   ;;  %v3630_v2 = vld [vmem:[#allocation26_spill] sm:$0xff] }
 0x548   :  { %1383 = vmatpush1.msra.mxu0 %v3620_v53  ;;  %1454 = vmatpush1.msra.mxu1 %v3621_v57  ;;  %v3631_v57 = vld [vmem:[#allocation23_spill] sm:$0xff] }
 0x549   :  { %1384 = vmatprep.subr.mxu0 %v3622_v22  ;;  %1455 = vmatprep.subr.mxu1 %v3623_v23  ;;  %v3632_v22 = vld [vmem:[#allocation9_spill] sm:$0xff] }
 0x54a   :  { %1385 = vmatpush1.msra.mxu0 %v3624_v63  ;;  %1456 = vmatpush1.msra.mxu1 %v3625_v44 }
 0x54b   :  { %1386 = vmatprep.subr.mxu0 %v3626_v45  ;;  %1457 = vmatprep.subr.mxu1 %v3627_v46 }
 0x54c   :  { %1387 = vmatpush1.msra.mxu0 %v3628_v50  ;;  %1420 = vmatprep.mubr.f32.mxu0 %v3629_v60 }
 0x54d   :  { %1458 = vmatpush1.msra.mxu1 %v3630_v2  ;;  %1491 = vmatprep.mubr.f32.mxu1 %v3629_v60  ;;  %v1823_v2 = vld [vmem:[%s3409_s1 + $0x28] sm:$0xff] }
 0x54e   :  { %1567 = vmatprep.subr.mxu0 %v3631_v57  ;;  %1638 = vmatprep.subr.mxu1 %v3632_v22 }
 0x5ed   :  { %v1211_v23 = vpop.f32.mrf.mxu0  ;;  %v1282_v63 = vpop.f32.mrf.mxu1 }
 0x5ef   :  { %v1213_v53 = vpop.f32.mrf.mxu0  ;;  %v1284_v44 = vpop.f32.mrf.mxu1 }
 0x5f0   :  { %v1291_v59 = vcombine.low %v1211_v23, %v1213_v53  ;;  %v1292_v45 = vcombine.low %v1282_v63, %v1284_v44 }
 0x5f2   :  { %v1299_v46 = vrot.slane %v1291_v59, %v2562_v6  ;;  %v1306_v50 = vrot.slane %v1292_v45, %v2562_v6 }
 0x5f4   :  { %v1307_v0 = vcombine.low %v1299_v46, %v1306_v50 }
 0x5f6   :  { %v1309_v60 = vadd.f32 %v1823_v2, %v1307_v0 }
 0x5f8   :  { %v1824_v49 = vmul.f32 -1.442695, %v1309_v60  ;;  %v1317_v57 = vrot.slane %v1309_v60, 2  ;;  %v1328_v48 = vrot.slane %v1309_v60, 6  ;;  %v1325_v53 = vrot.slane %v1309_v60, 4 }
 0x5fa   :  { %1924 = vpow2.f32 %v1824_v49  ;;  %v1825_v22 = vmul.f32 -1.442695, %v1317_v57  ;;  %v1826_v62 = vmul.f32 -1.442695, %v1328_v48  ;;  %v1347_v57 = vpop.permute.xlu1 %1346 }
 0x5fb   :  { %vm1348_vm13 = vcmp.eq.s32.totalorder %v1347_v57, 1 }
 0x5fc   :  { %1926 = vpow2.f32 %v1825_v22 }
 0x5fd   :  { %1928 = vpow2.f32 %v1826_v62 }
 0x607   :  { %v1925_v61 = vpop.eup %1924 }
 0x608   :  { %v1313_v23 = vadd.f32 1.0, %v1925_v61 }
 0x609   :  { %v1927_v63 = vpop.eup %1926 }
 0x60a   :  { %1930 = vrcp.f32 %v1313_v23  ;;  %v1322_v59 = vadd.f32 1.0, %v1927_v63  ;;  %v1929_v44 = vpop.eup %1928 }
 0x60b   :  { %1932 = vtanh.f32 %v1325_v53  ;;  %v1333_v2 = vadd.f32 1.0, %v1929_v44 }
 0x60c   :  { %1934 = vrcp.f32 %v1322_v59 }
 0x60d   :  { %1936 = vrcp.f32 %v1333_v2 }
 0x617   :  { %v1931_v45 = vpop.eup %1930 }
 0x618   :  { %v1933_v46 = vpop.eup %1932 }
 0x619   :  { %v1935_v0 = vpop.eup %1934  ;;  %v1337_v50 = vmul.f32 %v1933_v46, %v1931_v45 }
 0x61a   :  { %v1336_v49 = vmul.f32 %v1935_v0, %v3229_v20  ;;  %v1937_v62 = vpop.eup %1936 }
 0x61c   :  { %v1338_v22 = vadd.f32 %v1337_v50, %v1336_v49 }
 0x61e   :  { %1938 = vtanh.f32 %v1338_v22  ;;  %v3312_v61 = vsel %vm1348_vm13, %v1338_v22, %v3229_v20 }
 0x62b   :  { %v1939_v48 = vpop.eup %1938 }
 0x62c   :  { %v1340_v60 = vmul.f32 %v1939_v48, %v1937_v62 }
 0x62e   :  { %v1349_v53 = vsel %vm1348_vm13, %v1340_v60, 0.0  ;;  %v3315_v23 = vsel %vm1348_vm13, %v1340_v60, %v3232_v58  ;;  %v1558_v58 = vpop.permute.xlu0 %1557 }
 0x62f   :  { %1827 = vst [vmem:[%s3411_s3 + $0xa] sm:$0x3] %v1349_v53  ;;  %1421 = vmatmul.mubr.f32.vlgmr.msra.gmra.mxu0 %v3315_v23  ;;  %1492 = vmatmul.mubr.f32.vlgmr.msra.gmra.mxu1 %v3315_v23  ;;  %vm1559_vm14 = vcmp.eq.s32.totalorder %v1558_v58, 1 }
 0x630   :  { %1568 = vmatpush1.msra.mxu0 %v2756_v47  ;;  %1639 = vmatpush1.msra.mxu1 %v2855_v1  ;;  %v3633_v47 = vld [vmem:[#allocation7_spill] sm:$0xff]  ;;  %v3634_v1 = vld [vmem:[#allocation8_spill] sm:$0xff] }
 0x631   :  { %1569 = vmatprep.subr.mxu0 %v2861_v55  ;;  %1640 = vmatprep.subr.mxu1 %v2867_v56  ;;  %v3635_v55 = vld [vmem:[#allocation10_spill] sm:$0xff]  ;;  %v3636_v56 = vld [vmem:[#allocation11_spill] sm:$0xff] }
 0x632   :  { %1570 = vmatpush1.msra.mxu0 %v2873_v52  ;;  %1641 = vmatpush1.msra.mxu1 %v2879_v54  ;;  %v3637_v52 = vld [vmem:[#allocation12_spill] sm:$0xff]  ;;  %v3638_v54 = vld [vmem:[#allocation13_spill] sm:$0xff] }
 0x633   :  { %1571 = vmatprep.subr.mxu0 %v2885_v51  ;;  %1642 = vmatprep.subr.mxu1 %v2891_v3  ;;  %v3639_v51 = vld [vmem:[#allocation14_spill] sm:$0xff]  ;;  %v3640_v3 = vld [vmem:[#allocation15_spill] sm:$0xff] }
 0x634   :  { %1572 = vmatpush1.msra.mxu0 %v2897_v4  ;;  %1643 = vmatpush1.msra.mxu1 %v2903_v5  ;;  %v3641_v4 = vld [vmem:[#allocation16_spill] sm:$0xff]  ;;  %v3642_v5 = vld [vmem:[#allocation17_spill] sm:$0xff] }
 0x635   :  { %1573 = vmatprep.subr.mxu0 %v2909_v7  ;;  %1644 = vmatprep.subr.mxu1 %v2915_v8  ;;  %v3643_v7 = vld [vmem:[#allocation18_spill] sm:$0xff]  ;;  %v3644_v8 = vld [vmem:[#allocation19_spill] sm:$0xff] }
 0x636   :  { %1574 = vmatpush1.msra.mxu0 %v2921_v9  ;;  %1645 = vmatpush1.msra.mxu1 %v2927_v10  ;;  %v3645_v9 = vld [vmem:[#allocation20_spill] sm:$0xff]  ;;  %v3646_v10 = vld [vmem:[#allocation21_spill] sm:$0xff] }
 0x637   :  { %1575 = vmatprep.subr.mxu0 %v2933_v11  ;;  %1646 = vmatprep.subr.mxu1 %v2939_v12  ;;  %v3647_v11 = vld [vmem:[#allocation22_spill] sm:$0xff]  ;;  %v3648_v12 = vld [vmem:[#allocation24_spill] sm:$0xff] }
 0x638   :  { %1576 = vmatpush1.msra.mxu0 %v2945_v13  ;;  %1647 = vmatpush1.msra.mxu1 %v2951_v14  ;;  %v3649_v13 = vld [vmem:[#allocation25_spill] sm:$0xff]  ;;  %v3650_v14 = vmov 0.0  }
 0x639   :  { %1577 = vmatprep.subr.mxu0 %v2957_v15  ;;  %1648 = vmatprep.subr.mxu1 %v2963_v16  ;;  %v3651_v15 = vld [vmem:[#allocation26_spill] sm:$0xff] }
 0x63a   :  { %1578 = vmatpush1.msra.mxu0 %v2969_v17  ;;  %1649 = vmatpush1.msra.mxu1 %v2975_v18 }
 0x63b   :  { %1579 = vmatprep.subr.mxu0 %v2981_v19  ;;  %1650 = vmatprep.subr.mxu1 %v2987_v21 }
 0x63c   :  { %1580 = vmatpush1.msra.mxu0 %v2993_v24  ;;  %1651 = vmatpush1.msra.mxu1 %v2999_v25 }
 0x63d   :  { %1581 = vmatprep.subr.mxu0 %v3005_v26  ;;  %1652 = vmatprep.subr.mxu1 %v3011_v27  ;;  %v1828_v27 = vld [vmem:[%s3409_s1 + $0x30] sm:$0xff] }
 0x63e   :  { %1582 = vmatpush1.msra.mxu0 %v3017_v28  ;;  %1653 = vmatpush1.msra.mxu1 %v3023_v29 }
 0x63f   :  { %1583 = vmatprep.subr.mxu0 %v3029_v30  ;;  %1654 = vmatprep.subr.mxu1 %v3035_v31 }
 0x640   :  { %1584 = vmatpush1.msra.mxu0 %v3041_v32  ;;  %1655 = vmatpush1.msra.mxu1 %v3047_v33 }
 0x641   :  { %1585 = vmatprep.subr.mxu0 %v3053_v34  ;;  %1656 = vmatprep.subr.mxu1 %v3059_v35 }
 0x642   :  { %1586 = vmatpush1.msra.mxu0 %v3065_v36  ;;  %1657 = vmatpush1.msra.mxu1 %v3071_v37 }
 0x643   :  { %1587 = vmatprep.subr.mxu0 %v3077_v38  ;;  %1658 = vmatprep.subr.mxu1 %v3083_v39 }
 0x644   :  { %1588 = vmatpush1.msra.mxu0 %v3089_v40  ;;  %1659 = vmatpush1.msra.mxu1 %v3095_v41 }
 0x645   :  { %1589 = vmatprep.subr.mxu0 %v3101_v42  ;;  %1660 = vmatprep.subr.mxu1 %v3107_v43 }
 0x646   :  { %1590 = vmatpush1.msra.mxu0 %v3633_v47  ;;  %1661 = vmatpush1.msra.mxu1 %v3634_v1 }
 0x647   :  { %1591 = vmatprep.subr.mxu0 %v3635_v55  ;;  %1662 = vmatprep.subr.mxu1 %v3636_v56 }
 0x648   :  { %1592 = vmatpush1.msra.mxu0 %v3637_v52  ;;  %1663 = vmatpush1.msra.mxu1 %v3638_v54 }
 0x649   :  { %1593 = vmatprep.subr.mxu0 %v3639_v51  ;;  %1664 = vmatprep.subr.mxu1 %v3640_v3 }
 0x64a   :  { %1594 = vmatpush1.msra.mxu0 %v3641_v4  ;;  %1665 = vmatpush1.msra.mxu1 %v3642_v5 }
 0x64b   :  { %1595 = vmatprep.subr.mxu0 %v3643_v7  ;;  %1666 = vmatprep.subr.mxu1 %v3644_v8 }
 0x64c   :  { %1596 = vmatpush1.msra.mxu0 %v3645_v9  ;;  %1667 = vmatpush1.msra.mxu1 %v3646_v10 }
 0x64d   :  { %1597 = vmatprep.subr.mxu0 %v3647_v11  ;;  %1668 = vmatprep.subr.mxu1 %v3648_v12 }
 0x64e   :  { %1598 = vmatpush1.msra.mxu0 %v3649_v13  ;;  %1631 = vmatprep.mubr.f32.mxu0 %v3650_v14 }
 0x64f   :  { %1669 = vmatpush1.msra.mxu1 %v3651_v15  ;;  %1702 = vmatprep.mubr.f32.mxu1 %v3650_v14  ;;  %v1769_v14 = vpop.permute.xlu1 %1768 }
 0x650   :  { %vm1770_vm15 = vcmp.eq.s32.totalorder %v1769_v14, 1 }
 0x6ef   :  { %v1422_v16 = vpop.f32.mrf.mxu0  ;;  %v1493_v17 = vpop.f32.mrf.mxu1 }
 0x6f1   :  { %v1424_v18 = vpop.f32.mrf.mxu0  ;;  %v1495_v19 = vpop.f32.mrf.mxu1 }
 0x6f2   :  { %v1502_v21 = vcombine.low %v1422_v16, %v1424_v18  ;;  %v1503_v24 = vcombine.low %v1493_v17, %v1495_v19 }
 0x6f4   :  { %v1510_v25 = vrot.slane %v1502_v21, %v2562_v6  ;;  %v1517_v26 = vrot.slane %v1503_v24, %v2562_v6 }
 0x6f6   :  { %v1518_v28 = vcombine.low %v1510_v25, %v1517_v26 }
 0x6f8   :  { %v1520_v29 = vadd.f32 %v1828_v27, %v1518_v28 }
 0x6fa   :  { %v1829_v30 = vmul.f32 -1.442695, %v1520_v29  ;;  %v1528_v31 = vrot.slane %v1520_v29, 2  ;;  %v1539_v33 = vrot.slane %v1520_v29, 6  ;;  %v1536_v36 = vrot.slane %v1520_v29, 4 }
 0x6fc   :  { %1940 = vpow2.f32 %v1829_v30  ;;  %v1830_v32 = vmul.f32 -1.442695, %v1528_v31  ;;  %v1831_v34 = vmul.f32 -1.442695, %v1539_v33 }
 0x6fe   :  { %1942 = vpow2.f32 %v1830_v32 }
 0x6ff   :  { %1944 = vpow2.f32 %v1831_v34 }
 0x709   :  { %v1941_v35 = vpop.eup %1940 }
 0x70a   :  { %v1524_v37 = vadd.f32 1.0, %v1941_v35 }
 0x70b   :  { %v1943_v38 = vpop.eup %1942 }
 0x70c   :  { %1946 = vrcp.f32 %v1524_v37  ;;  %v1533_v39 = vadd.f32 1.0, %v1943_v38  ;;  %v1945_v40 = vpop.eup %1944 }
 0x70d   :  { %1948 = vtanh.f32 %v1536_v36  ;;  %v1544_v20 = vadd.f32 1.0, %v1945_v40 }
 0x70e   :  { %1950 = vrcp.f32 %v1533_v39 }
 0x70f   :  { %1952 = vrcp.f32 %v1544_v20 }
 0x719   :  { %v1947_v41 = vpop.eup %1946 }
 0x71a   :  { %v1949_v42 = vpop.eup %1948 }
 0x71b   :  { %v1951_v43 = vpop.eup %1950  ;;  %v1548_v59 = vmul.f32 %v1949_v42, %v1947_v41 }
 0x71c   :  { %v1547_v63 = vmul.f32 %v1951_v43, %v3312_v61  ;;  %v1953_v46 = vpop.eup %1952 }
 0x71e   :  { %v1549_v44 = vadd.f32 %v1548_v59, %v1547_v63 }
 0x720   :  { %1954 = vtanh.f32 %v1549_v44  ;;  %v1564_v45 = vsel %vm1559_vm14, %v1549_v44, %v3312_v61 }
 0x72d   :  { %v1955_v0 = vpop.eup %1954 }
 0x72e   :  { %v1551_v2 = vmul.f32 %v1955_v0, %v1953_v46 }
 0x730   :  { %v1560_v49 = vsel %vm1559_vm14, %v1551_v2, 0.0  ;;  %v1563_v50 = vsel %vm1559_vm14, %v1551_v2, %v3315_v23  ;;  %v1833_v23 = vld [vmem:[%s3409_s1 + $0x38] sm:$0xff]  ;;  %s2061_s1 = smov [#allocation4]  }
 0x731   :  { %1832 = vst [vmem:[%s3411_s3 + $0xc] sm:$0x3] %v1560_v49  ;;  %1632 = vmatmul.mubr.f32.vlgmr.msra.gmra.mxu0 %v1563_v50  ;;  %1703 = vmatmul.mubr.f32.vlgmr.msra.gmra.mxu1 %v1563_v50  ;;  %s1790_s10 = sshll.u32 %s2061_s1, 4  ;;  %s1791_s10 = int_to_ptr.vmem [resolvable:$true] %s1790_s10 }
 0x732   :  { %s2036_s12 = scalar_lea.vmem %s1791_s10, 32  ;;  %p2041_p1 = scmp.lt.s32.totalorder %s1791_s10, %s1791_s10 }
 0x733   :  { %p2037_p0 = scmp.ne.s32.totalorder %s1791_s10, %s2036_s12  ;;  %p2042_p2 = scmp.lt.s32.totalorder %s2036_s12, %s2036_s12 }
 0x735   :  { %p2043_p3 = por %p2042_p2, %p2041_p1 }
 0x737   :  { %p2044_p4 = pnand %p2043_p3, %p2037_p0 }
 0x7f1   :  { %v1633_v57 = vpop.f32.mrf.mxu0  ;;  %v1704_v22 = vpop.f32.mrf.mxu1 }
 0x7f3   :  { %v1635_v62 = vpop.f32.mrf.mxu0  ;;  %v1706_v48 = vpop.f32.mrf.mxu1 }
 0x7f4   :  { %v1713_v60 = vcombine.low %v1633_v57, %v1635_v62  ;;  %v1714_v53 = vcombine.low %v1704_v22, %v1706_v48 }
 0x7f6   :  { %v1721_v61 = vrot.slane %v1713_v60, %v2562_v6  ;;  %v1728_v47 = vrot.slane %v1714_v53, %v2562_v6 }
 0x7f8   :  { %v1729_v1 = vcombine.low %v1721_v61, %v1728_v47 }
 0x7fa   :  { %v1731_v55 = vadd.f32 %v1833_v23, %v1729_v1 }
 0x7fc   :  { %v1834_v56 = vmul.f32 -1.442695, %v1731_v55  ;;  %v1739_v52 = vrot.slane %v1731_v55, 2  ;;  %v1750_v51 = vrot.slane %v1731_v55, 6  ;;  %v1747_v5 = vrot.slane %v1731_v55, 4 }
 0x7fe   :  { %1956 = vpow2.f32 %v1834_v56  ;;  %v1835_v54 = vmul.f32 -1.442695, %v1739_v52  ;;  %v1836_v3 = vmul.f32 -1.442695, %v1750_v51 }
 0x800   :  { %1958 = vpow2.f32 %v1835_v54 }
 0x801   :  { %1960 = vpow2.f32 %v1836_v3 }
 0x80b   :  { %v1957_v4 = vpop.eup %1956 }
 0x80c   :  { %v1735_v7 = vadd.f32 1.0, %v1957_v4 }
 0x80d   :  { %v1959_v8 = vpop.eup %1958 }
 0x80e   :  { %1962 = vrcp.f32 %v1735_v7  ;;  %v1744_v6 = vadd.f32 1.0, %v1959_v8  ;;  %v1961_v9 = vpop.eup %1960 }
 0x80f   :  { %1964 = vtanh.f32 %v1747_v5  ;;  %v1755_v13 = vadd.f32 1.0, %v1961_v9 }
 0x810   :  { %1966 = vrcp.f32 %v1744_v6 }
 0x811   :  { %1968 = vrcp.f32 %v1755_v13 }
 0x81b   :  { %v1963_v10 = vpop.eup %1962 }
 0x81c   :  { %v1965_v11 = vpop.eup %1964 }
 0x81d   :  { %v1967_v12 = vpop.eup %1966  ;;  %v1759_v16 = vmul.f32 %v1965_v11, %v1963_v10 }
 0x81e   :  { %v1758_v15 = vmul.f32 %v1967_v12, %v1564_v45  ;;  %v1969_v19 = vpop.eup %1968 }
 0x820   :  { %v1760_v17 = vadd.f32 %v1759_v16, %v1758_v15 }
 0x822   :  { %1970 = vtanh.f32 %v1760_v17  ;;  %v1775_v18 = vsel %vm1770_vm15, %v1760_v17, %v1564_v45 }
 0x823   :  { %1777 = vst [vmem:[#allocation3] sm:$0x3] %v1775_v18 }
 0x82f   :  { %v1971_v21 = vpop.eup %1970 }
 0x830   :  { %v1762_v24 = vmul.f32 %v1971_v21, %v1969_v19 }
 0x832   :  { %v1771_v25 = vsel %vm1770_vm15, %v1762_v24, 0.0  ;;  %v1774_v26 = vsel %vm1770_vm15, %v1762_v24, %v1563_v50 }
 0x833   :  { %1837 = vst [vmem:[%s3411_s3 + $0xe] sm:$0x3] %v1771_v25  ;;  %1776 = vst [vmem:[#allocation2] sm:$0x3] %v1774_v26 }
 0x834   :  { %1781 = vst [vmem:[#allocation4] sm:$0x3] %v1774_v26 }
 0x835   :  { %2047 = shalt.err (!%p2044_p4)
}
 0x836   :  { %1793 = dma.vmem_to_hbm [thread:$0]  %s1791_s10, 32, %s3412_s4, [#allocation5]  }
 0x837   :  { %2056 = dma.done.wait [#allocation5], 32  }
 0x838   :  { %2057 = vsyncadd [#allocation5], 4294967264 }
 0x839   :  { %1799 = vsyncpa [#allocation5], 1 }

</bundles_post_ra>
